<compile_context>
chip_gen: v7x
topology: tpu7x:2x2x1
jax: 0.10.0
libtpu: 0.0.40
codegen_flags: <defaults>
</compile_context>

<pallas_src>
import functools

import numpy as np
import jax
import jax.numpy as jnp
from jax import lax
from jax.experimental import pallas as pl
from jax.experimental.pallas import tpu as pltpu


def _silu(y):
    # sigmoid via EUP exp + approx reciprocal (keeps the divide off the VPU).
    return y * pl.reciprocal(1.0 + jnp.exp(-y), approx=True)


def _colsum(x):
    # Per-channel (row) sums of a (C, T) f32 tile as a ones-vector matmul: the
    # MXU is nearly idle here (conv contraction is only K*K*Cin), so this
    # frees the VPU/XLU slots for the rest of the pass.
    ones = jnp.ones((x.shape[1], 1), jnp.float32)
    return jnp.dot(x, ones, preferred_element_type=jnp.float32)          # (C, 1)


def _gn_scale_shift(sum_c, sq_c, mask, maskt, gamma, beta, inv_n, eps):
    # sum_c / sq_c: (Cout, 1) per-channel sums; mask: (Cout, G); maskt: (G, Cout).
    sum_g = jnp.dot(maskt, sum_c, preferred_element_type=jnp.float32)    # (G, 1)
    sq_g = jnp.dot(maskt, sq_c, preferred_element_type=jnp.float32)      # (G, 1)
    mean_g = sum_g * inv_n
    # single-pass variance E[x^2] - mean^2 (clamped >= 0); fine in f32 for
    # these activation scales / group sizes.
    var_g = jnp.maximum(sq_g * inv_n - mean_g * mean_g, 0.0)
    inv_std_g = lax.rsqrt(var_g + eps)
    mean_c = jnp.dot(mask, mean_g, preferred_element_type=jnp.float32)   # (Cout, 1)
    inv_std_c = jnp.dot(mask, inv_std_g, preferred_element_type=jnp.float32)
    scale = inv_std_c * gamma
    shift = beta - mean_c * scale
    return scale, shift


def _conv_silu_kernel(patch_ref, w_ref, o_ref):
    # patch_ref: (1, Kin, tile) bf16; w_ref: (Cout, Kin) bf16; o_ref: (1, Cout, tile)
    acc = jnp.dot(w_ref[...], patch_ref[0], preferred_element_type=jnp.float32)
    o_ref[0] = _silu(acc).astype(o_ref.dtype)


def _conv_gn_silu_fused_kernel(patch_ref, w_ref, maskt_ref, mask_ref, g_ref, b_ref,
                               o_ref, *, hw_total, cg, eps):
    # One spatial tile covers the whole image: single fused pass.
    acc = jnp.dot(w_ref[...], patch_ref[0],
                  preferred_element_type=jnp.float32)                    # (Cout, tile)
    sum_c = _colsum(acc)
    sq_c = _colsum(acc * acc)
    scale, shift = _gn_scale_shift(sum_c, sq_c, mask_ref[...], maskt_ref[...],
                                   g_ref[...], b_ref[...],
                                   jnp.float32(1.0 / (hw_total * cg)), eps)
    o_ref[0] = _silu(acc * scale + shift).astype(o_ref.dtype)


def _conv_gn_silu_twopass_kernel(patch_ref, w_ref, maskt_ref, mask_ref, g_ref, b_ref,
                                 o_ref, sum_ref, sq_ref, scale_ref, shift_ref,
                                 *maybe_cache, hw_total, cg, eps, use_cache):
    # grid = (N, pass, tile).  Pass 0 accumulates per-channel stats (and caches
    # the conv tiles in VMEM); pass 1 normalizes + SiLU + writes.
    p = pl.program_id(1)
    t = pl.program_id(2)
    cache_ref = maybe_cache[0] if use_cache else None

    @pl.when(p == 0)
    def _stats_pass():
        acc = jnp.dot(w_ref[...], patch_ref[0], preferred_element_type=jnp.float32)

        @pl.when(t == 0)
        def _init():
            sum_ref[...] = jnp.zeros_like(sum_ref)
            sq_ref[...] = jnp.zeros_like(sq_ref)

        sum_ref[...] += _colsum(acc)
        sq_ref[...] += _colsum(acc * acc)
        if use_cache:
            cache_ref[t] = acc.astype(cache_ref.dtype)

    @pl.when(p == 1)
    def _write_pass():
        @pl.when(t == 0)
        def _finalize_stats():
            # hoisted: scale/shift computed once per image, reused for all tiles
            scale, shift = _gn_scale_shift(sum_ref[...], sq_ref[...], mask_ref[...],
                                           maskt_ref[...], g_ref[...], b_ref[...],
                                           jnp.float32(1.0 / (hw_total * cg)), eps)
            scale_ref[...] = scale
            shift_ref[...] = shift

        if use_cache:
            acc = cache_ref[t].astype(jnp.float32)
        else:
            # fallback when the conv result does not fit the VMEM cache budget
            acc = jnp.dot(w_ref[...], patch_ref[0], preferred_element_type=jnp.float32)
        o_ref[0] = _silu(acc * scale_ref[...] + shift_ref[...]).astype(o_ref.dtype)


def _choose_tile_hw(hw, cout, kin, budget_bytes=8 * 1024 * 1024):
    """Largest multiple-of-128 HW tile whose per-step footprint fits the budget."""
    # bytes per output column: patch (bf16, 2 bufs) + output (bf16, 2 bufs)
    # + ~6 live f32 (Cout,) intermediates
    per_col = 4 * kin + 28 * cout
    max_tile = max(128, (budget_bytes // per_col) // 128 * 128)
    hw_pad = -(-hw // 128) * 128
    return hw_pad if hw_pad <= max_tile else max_tile


def _vmem_limit_bytes(kin, cout, tile_hw, cache_bytes):
    est = (4 * kin * tile_hw          # patch block, bf16, double-buffered
           + 4 * cout * tile_hw       # output block, bf16, double-buffered
           + 4 * cout * kin           # weight, bf16, double-buffered
           + 32 * cout * tile_hw      # ~8 live f32 (Cout, tile) intermediates
           + cache_bytes
           + (1 << 20))               # masks / gamma / stats / slack
    return int(min(max(2 * est, 32 << 20), 48 << 20))


def conv_block_forward(x_nchw, weight_oihw, gamma=None, beta=None, *,
                       gn=True, eps=1e-5, tile_hw=None, cache_conv=None):
    """Pallas ConvBlock.forward (NCHW in / NCHW out, bf16 output)."""
    N, Cin, H, W = x_nchw.shape
    Cout, Cin_w, K, K2 = weight_oihw.shape
    assert Cin_w == Cin and K == K2 and K % 2 == 1
    pad = (K - 1) // 2
    n_groups = Cout // 8
    use_gn = bool(gn) and n_groups >= 16       # matches the PyTorch module's gate
    HW = H * W
    Kin = K * K * Cin

    # --- wrapper glue: channels-major im2col (N, Kin, HW) in bf16 ---
    # TODO(synk): form the K*K taps in-kernel from a halo'd input tile instead of
    # materializing the K*K-expanded im2col array in HBM (dominant input traffic
    # once Cin is non-trivial).
    x = x_nchw.astype(jnp.bfloat16)
    x_pad = jnp.pad(x, ((0, 0), (0, 0), (pad, pad), (pad, pad)))
    patches = jnp.concatenate(
        [x_pad[:, :, kh:kh + H, kw:kw + W] for kh in range(K) for kw in range(K)],
        axis=1).reshape(N, Kin, HW)                                   # (N, Kin, HW)
    w_mat = jnp.transpose(weight_oihw, (0, 2, 3, 1)).reshape(Cout, Kin)
    w_mat = w_mat.astype(jnp.bfloat16)                                # (Cout, Kin)

    if tile_hw is None:
        tile_hw = _choose_tile_hw(HW, Cout, Kin)
    else:
        assert tile_hw % 128 == 0 or tile_hw >= HW, "tile_hw must be a multiple of 128"
    # Pad HW up to a tile multiple: padded patch columns are zero, so the conv
    # output there is zero and contributes nothing to the GroupNorm sums.
    HW_pad = -(-HW // tile_hw) * tile_hw
    if HW_pad != HW:
        patches = jnp.pad(patches, ((0, 0), (0, 0), (0, HW_pad - HW)))
    T = HW_pad // tile_hw
    out_dtype = jnp.bfloat16

    patch_spec = pl.BlockSpec((1, Kin, tile_hw), lambda n, p, t: (n, 0, t))
    w_spec = pl.BlockSpec((Cout, Kin), lambda n, p, t: (0, 0))
    out_shape = jax.ShapeDtypeStruct((N, Cout, HW_pad), out_dtype)

    # TODO(synk): add a Cout-block grid axis (whole groups per block, marked
    # "parallel") so v7x's second TensorCore is used when N == 1.

    if not use_gn:
        out = pl.pallas_call(
            _conv_silu_kernel,
            out_shape=out_shape,
            grid=(N, 1, T),
            in_specs=[patch_spec, w_spec],
            out_specs=pl.BlockSpec((1, Cout, tile_hw), lambda n, p, t: (n, 0, t)),
            compiler_params=pltpu.CompilerParams(
                dimension_semantics=("parallel", "arbitrary", "arbitrary"),
                vmem_limit_bytes=_vmem_limit_bytes(Kin, Cout, tile_hw, 0)),
        )(patches, w_mat)
    else:
        G = n_groups
        cg = Cout // G
        mask_np = np.equal(np.arange(Cout)[:, None] // cg,
                           np.arange(G)[None, :]).astype(np.float32)    # (Cout, G)
        mask = jnp.asarray(mask_np)
        maskt = jnp.asarray(mask_np.T)                                  # (G, Cout)
        gamma = jnp.ones((Cout,), jnp.float32) if gamma is None else gamma
        beta = jnp.zeros((Cout,), jnp.float32) if beta is None else beta
        gamma2 = gamma.reshape(Cout, 1).astype(jnp.float32)
        beta2 = beta.reshape(Cout, 1).astype(jnp.float32)

        maskt_spec = pl.BlockSpec((G, Cout), lambda n, p, t: (0, 0))
        mask_spec = pl.BlockSpec((Cout, G), lambda n, p, t: (0, 0))
        gb_spec = pl.BlockSpec((Cout, 1), lambda n, p, t: (0, 0))

        if T == 1:
            kernel = functools.partial(_conv_gn_silu_fused_kernel,
                                       hw_total=HW, cg=cg, eps=eps)
            out = pl.pallas_call(
                kernel,
                out_shape=out_shape,
                grid=(N, 1, 1),
                in_specs=[patch_spec, w_spec, maskt_spec, mask_spec, gb_spec, gb_spec],
                out_specs=pl.BlockSpec((1, Cout, tile_hw), lambda n, p, t: (n, 0, t)),
                compiler_params=pltpu.CompilerParams(
                    dimension_semantics=("parallel", "arbitrary", "arbitrary"),
                    vmem_limit_bytes=_vmem_limit_bytes(Kin, Cout, tile_hw, 0)),
            )(patches, w_mat, maskt, mask, gamma2, beta2)
        else:
            # two passes: pass 0 = stats (+ conv cache), pass 1 = normalize + write
            cache_budget = 8 * 1024 * 1024
            cache_dtype = (jnp.float32 if Cout * HW_pad * 4 <= cache_budget
                           else jnp.bfloat16)
            fits = Cout * HW_pad * jnp.dtype(cache_dtype).itemsize <= cache_budget
            use_cache = fits if cache_conv is None else (bool(cache_conv) and fits)
            cache_bytes = (Cout * HW_pad * jnp.dtype(cache_dtype).itemsize
                           if use_cache else 0)

            scratch = [pltpu.VMEM((Cout, 1), jnp.float32)] * 4   # sum, sumsq, scale, shift
            if use_cache:
                scratch = scratch + [pltpu.VMEM((T, Cout, tile_hw), cache_dtype)]

            if use_cache:
                # pass 1 parks the patch block on the last pass-0 block index so
                # the patch stream is only DMA'd from HBM once per image.
                patch_map = lambda n, p, t: (n, 0, t * (1 - p) + (T - 1) * p)
            else:
                patch_map = lambda n, p, t: (n, 0, t)
            # pass 0 parks the output block on index 0; it is only written (and
            # only written back to HBM) during pass 1.
            out_map = lambda n, p, t: (n, 0, t * p)

            kernel = functools.partial(_conv_gn_silu_twopass_kernel,
                                       hw_total=HW, cg=cg, eps=eps,
                                       use_cache=use_cache)
            out = pl.pallas_call(
                kernel,
                out_shape=out_shape,
                grid=(N, 2, T),
                in_specs=[pl.BlockSpec((1, Kin, tile_hw), patch_map), w_spec,
                          maskt_spec, mask_spec, gb_spec, gb_spec],
                out_specs=pl.BlockSpec((1, Cout, tile_hw), out_map),
                scratch_shapes=scratch,
                compiler_params=pltpu.CompilerParams(
                    dimension_semantics=("parallel", "arbitrary", "arbitrary"),
                    vmem_limit_bytes=_vmem_limit_bytes(Kin, Cout, tile_hw, cache_bytes)),
            )(patches, w_mat, maskt, mask, gamma2, beta2)

    if HW_pad != HW:
        out = out[:, :, :HW]
    return out.reshape(N, Cout, H, W)


def _reference_forward(x, w, gamma, beta, *, gn=True, eps=1e-5):
    """Pure-JAX reference matching the PyTorch module (bf16 conv inputs)."""
    Cout = w.shape[0]
    K = w.shape[2]
    n_groups = Cout // 8
    use_gn = gn and n_groups >= 16
    y = lax.conv_general_dilated(
        x.astype(jnp.bfloat16), w.astype(jnp.bfloat16),
        window_strides=(1, 1),
        padding=[(K // 2, K // 2)] * 2,
        dimension_numbers=("NCHW", "OIHW", "NCHW"),
        preferred_element_type=jnp.float32)
    if use_gn:
        N, C, H, W = y.shape
        yg = y.reshape(N, n_groups, -1)
        mean = yg.mean(-1, keepdims=True)
        var = yg.var(-1, keepdims=True)
        yg = (yg - mean) / jnp.sqrt(var + eps)
        y = yg.reshape(N, C, H, W)
        y = y * gamma.reshape(1, C, 1, 1) + beta.reshape(1, C, 1, 1)
    return y * jax.nn.sigmoid(y)


if __name__ == "__main__":
    kx, kwt, kg, kb = jax.random.split(jax.random.PRNGKey(0), 4)

    def run_case(N, Cin, H, W, Cout, K, gn, tile_hw=None, cache_conv=None):
        x = jax.random.normal(kx, (N, Cin, H, W), jnp.float32)
        weight = jax.random.normal(kwt, (Cout, Cin, K, K), jnp.float32) * 0.1
        gamma = 1.0 + 0.1 * jax.random.normal(kg, (Cout,), jnp.float32)
        beta = 0.1 * jax.random.normal(kb, (Cout,), jnp.float32)
        out = jax.block_until_ready(conv_block_forward(
            x, weight, gamma, beta, gn=gn, tile_hw=tile_hw, cache_conv=cache_conv))
        ref = jax.block_until_ready(
            _reference_forward(x, weight, gamma, beta, gn=gn))
        out32 = out.astype(jnp.float32)
        if not jnp.allclose(out32, ref, atol=3e-2, rtol=3e-2):
            max_err = jnp.max(jnp.abs(out32 - ref))
            raise AssertionError(
                f"mismatch (gn={gn}, tile_hw={tile_hw}, cache={cache_conv}): "
                f"max abs err = {max_err}")

    # main config: GroupNorm active (Cout=128 -> 16 groups), single fused pass
    run_case(2, 4, 16, 16, 128, 3, gn=True)
    # Identity-norm path (gn disabled)
    run_case(2, 4, 16, 16, 128, 3, gn=False)
    # multi-tile two-pass GroupNorm path with VMEM conv cache (2 tiles of 128)
    run_case(2, 4, 16, 16, 128, 3, gn=True, tile_hw=128)
    # multi-tile two-pass GroupNorm path with the recompute fallback
    run_case(2, 4, 16, 16, 128, 3, gn=True, tile_hw=128, cache_conv=False)
    # ragged spatial size (HW=100 padded to 128; stats use the true pixel count)
    run_case(2, 4, 10, 10, 128, 3, gn=True)

    print("KERNEL_OK")
</pallas_src>

<mosaic_0001>
module attributes {stable_mosaic.version = 11 : i64} {
  func.func @_conv_gn_silu_fused_kernel(%arg0: i32, %arg1: i32, %arg2: i32, %arg3: memref<1x36x256xbf16, #tpu.memory_space<vmem>>, %arg4: memref<128x36xbf16, #tpu.memory_space<vmem>>, %arg5: memref<16x128xf32, #tpu.memory_space<vmem>>, %arg6: memref<128x16xf32, #tpu.memory_space<vmem>>, %arg7: memref<128x1xf32, #tpu.memory_space<vmem>>, %arg8: memref<128x1xf32, #tpu.memory_space<vmem>>, %arg9: memref<1x128x256xbf16, #tpu.memory_space<vmem>>) attributes {dimension_semantics = [#tpu.dimension_semantics<parallel>, #tpu.dimension_semantics<arbitrary>, #tpu.dimension_semantics<arbitrary>], iteration_bounds = array<i64: 2, 1, 1>, scalar_prefetch = 0 : i64, scratch_operands = 0 : i64, tpu.core_type = #tpu.core_type<tc>, window_params = [{transform_indices = @transform_0, window_bounds = array<i64: 1, 36, 256>}, {pipeline_mode = #tpu.pipeline_mode<synchronous>, transform_indices = @transform_1, window_bounds = array<i64: 128, 36>}, {pipeline_mode = #tpu.pipeline_mode<synchronous>, transform_indices = @transform_2, window_bounds = array<i64: 16, 128>}, {pipeline_mode = #tpu.pipeline_mode<synchronous>, transform_indices = @transform_3, window_bounds = array<i64: 128, 16>}, {pipeline_mode = #tpu.pipeline_mode<synchronous>, transform_indices = @transform_4, window_bounds = array<i64: 128, 1>}, {pipeline_mode = #tpu.pipeline_mode<synchronous>, transform_indices = @transform_5, window_bounds = array<i64: 128, 1>}, {transform_indices = @transform_6, window_bounds = array<i64: 1, 128, 256>}]} {
    %c0 = arith.constant 0 : index
    %c0_0 = arith.constant 0 : index
    %0 = vector.load %arg4[%c0, %c0_0] : memref<128x36xbf16, #tpu.memory_space<vmem>>, vector<128x36xbf16>
    %c0_1 = arith.constant 0 : index
    %c0_2 = arith.constant 0 : index
    %c0_3 = arith.constant 0 : index
    %1 = vector.load %arg3[%c0_1, %c0_2, %c0_3] : memref<1x36x256xbf16, #tpu.memory_space<vmem>>, vector<1x36x256xbf16>
    %2 = vector.shape_cast %1 : vector<1x36x256xbf16> to vector<36x256xbf16>
    %cst = arith.constant dense<0.000000e+00> : vector<128x256xf32>
    %3 = tpu.matmul %0, %2, %cst {dimension_numbers = #tpu.dot_dimension_numbers<[1], [0], [0], [1], [0, 0, 1, 1], [], []>} : vector<128x36xbf16>, vector<36x256xbf16>, vector<128x256xf32> -> vector<128x256xf32>
    %cst_4 = arith.constant 1.000000e+00 : f32
    %4 = vector.broadcast %cst_4 : f32 to vector<256x1xf32>
    %cst_5 = arith.constant dense<0.000000e+00> : vector<128x1xf32>
    %5 = tpu.matmul %3, %4, %cst_5 {dimension_numbers = #tpu.dot_dimension_numbers<[1], [0], [0], [1], [0, 0, 1, 1], [], []>} : vector<128x256xf32>, vector<256x1xf32>, vector<128x1xf32> -> vector<128x1xf32>
    %6 = arith.mulf %3, %3 : vector<128x256xf32>
    %cst_6 = arith.constant 1.000000e+00 : f32
    %7 = vector.broadcast %cst_6 : f32 to vector<256x1xf32>
    %cst_7 = arith.constant dense<0.000000e+00> : vector<128x1xf32>
    %8 = tpu.matmul %6, %7, %cst_7 {dimension_numbers = #tpu.dot_dimension_numbers<[1], [0], [0], [1], [0, 0, 1, 1], [], []>} : vector<128x256xf32>, vector<256x1xf32>, vector<128x1xf32> -> vector<128x1xf32>
    %c0_8 = arith.constant 0 : index
    %c0_9 = arith.constant 0 : index
    %9 = vector.load %arg6[%c0_8, %c0_9] : memref<128x16xf32, #tpu.memory_space<vmem>>, vector<128x16xf32>
    %c0_10 = arith.constant 0 : index
    %c0_11 = arith.constant 0 : index
    %10 = vector.load %arg5[%c0_10, %c0_11] : memref<16x128xf32, #tpu.memory_space<vmem>>, vector<16x128xf32>
    %c0_12 = arith.constant 0 : index
    %c0_13 = arith.constant 0 : index
    %11 = vector.load %arg7[%c0_12, %c0_13] : memref<128x1xf32, #tpu.memory_space<vmem>>, vector<128x1xf32>
    %c0_14 = arith.constant 0 : index
    %c0_15 = arith.constant 0 : index
    %12 = vector.load %arg8[%c0_14, %c0_15] : memref<128x1xf32, #tpu.memory_space<vmem>>, vector<128x1xf32>
    %cst_16 = arith.constant dense<0.000000e+00> : vector<16x1xf32>
    %13 = tpu.matmul %10, %5, %cst_16 {dimension_numbers = #tpu.dot_dimension_numbers<[1], [0], [0], [1], [0, 0, 1, 1], [], []>} : vector<16x128xf32>, vector<128x1xf32>, vector<16x1xf32> -> vector<16x1xf32>
    %cst_17 = arith.constant dense<0.000000e+00> : vector<16x1xf32>
    %14 = tpu.matmul %10, %8, %cst_17 {dimension_numbers = #tpu.dot_dimension_numbers<[1], [0], [0], [1], [0, 0, 1, 1], [], []>} : vector<16x128xf32>, vector<128x1xf32>, vector<16x1xf32> -> vector<16x1xf32>
    %cst_18 = arith.constant 4.8828125E-4 : f32
    %15 = vector.broadcast %cst_18 : f32 to vector<16x1xf32>
    %16 = arith.mulf %13, %15 : vector<16x1xf32>
    %cst_19 = arith.constant 4.8828125E-4 : f32
    %17 = vector.broadcast %cst_19 : f32 to vector<16x1xf32>
    %18 = arith.mulf %14, %17 : vector<16x1xf32>
    %19 = arith.mulf %16, %16 : vector<16x1xf32>
    %20 = arith.subf %18, %19 : vector<16x1xf32>
    %cst_20 = arith.constant 0.000000e+00 : f32
    %21 = vector.broadcast %cst_20 : f32 to vector<16x1xf32>
    %22 = arith.maximumf %20, %21 : vector<16x1xf32>
    %cst_21 = arith.constant 9.99999974E-6 : f32
    %23 = vector.broadcast %cst_21 : f32 to vector<16x1xf32>
    %24 = arith.addf %22, %23 : vector<16x1xf32>
    %25 = math.rsqrt %24 : vector<16x1xf32>
    %cst_22 = arith.constant dense<0.000000e+00> : vector<128x1xf32>
    %26 = tpu.matmul %9, %16, %cst_22 {dimension_numbers = #tpu.dot_dimension_numbers<[1], [0], [0], [1], [0, 0, 1, 1], [], []>} : vector<128x16xf32>, vector<16x1xf32>, vector<128x1xf32> -> vector<128x1xf32>
    %cst_23 = arith.constant dense<0.000000e+00> : vector<128x1xf32>
    %27 = tpu.matmul %9, %25, %cst_23 {dimension_numbers = #tpu.dot_dimension_numbers<[1], [0], [0], [1], [0, 0, 1, 1], [], []>} : vector<128x16xf32>, vector<16x1xf32>, vector<128x1xf32> -> vector<128x1xf32>
    %28 = arith.mulf %27, %11 : vector<128x1xf32>
    %29 = arith.mulf %26, %28 : vector<128x1xf32>
    %30 = arith.subf %12, %29 : vector<128x1xf32>
    %31 = vector.broadcast %28 : vector<128x1xf32> to vector<128x256xf32>
    %32 = arith.mulf %3, %31 : vector<128x256xf32>
    %33 = vector.broadcast %30 : vector<128x1xf32> to vector<128x256xf32>
    %34 = arith.addf %32, %33 : vector<128x256xf32>
    %cst_24 = arith.constant 0.000000e+00 : f32
    %35 = vector.broadcast %cst_24 : f32 to vector<128x256xf32>
    %36 = arith.subf %35, %34 : vector<128x256xf32>
    %37 = math.exp %36 : vector<128x256xf32>
    %cst_25 = arith.constant 1.000000e+00 : f32
    %38 = vector.broadcast %cst_25 : f32 to vector<128x256xf32>
    %39 = arith.addf %38, %37 : vector<128x256xf32>
    %40 = tpu.reciprocal %39 {approx = true} : vector<128x256xf32> -> vector<128x256xf32>
    %41 = arith.mulf %34, %40 : vector<128x256xf32>
    %42 = arith.truncf %41 : vector<128x256xf32> to vector<128x256xbf16>
    %c0_26 = arith.constant 0 : index
    %c0_27 = arith.constant 0 : index
    %c0_28 = arith.constant 0 : index
    %43 = vector.load %arg9[%c0_26, %c0_27, %c0_28] : memref<1x128x256xbf16, #tpu.memory_space<vmem>>, vector<1x128x256xbf16>
    %44 = vector.shape_cast %43 : vector<1x128x256xbf16> to vector<128x256xbf16>
    %45 = vector.shape_cast %42 : vector<128x256xbf16> to vector<1x128x256xbf16>
    tpu.vector_store %arg9[%c0_26, %c0_27, %c0_28], %45 {strides = array<i32>} : memref<1x128x256xbf16, #tpu.memory_space<vmem>>, vector<1x128x256xbf16>,
    return
  }
  func.func @transform_0(%arg0: i32, %arg1: i32, %arg2: i32) -> (i32, i32, i32) {
    %c0_i32 = arith.constant 0 : i32
    %c0_i32_0 = arith.constant 0 : i32
    return %arg0, %c0_i32, %arg2 : i32, i32, i32
  }
  func.func @transform_1(%arg0: i32, %arg1: i32, %arg2: i32) -> (i32, i32) {
    %c0_i32 = arith.constant 0 : i32
    %c0_i32_0 = arith.constant 0 : i32
    %c0_i32_1 = arith.constant 0 : i32
    return %c0_i32, %c0_i32_0 : i32, i32
  }
  func.func @transform_2(%arg0: i32, %arg1: i32, %arg2: i32) -> (i32, i32) {
    %c0_i32 = arith.constant 0 : i32
    %c0_i32_0 = arith.constant 0 : i32
    %c0_i32_1 = arith.constant 0 : i32
    return %c0_i32, %c0_i32_0 : i32, i32
  }
  func.func @transform_3(%arg0: i32, %arg1: i32, %arg2: i32) -> (i32, i32) {
    %c0_i32 = arith.constant 0 : i32
    %c0_i32_0 = arith.constant 0 : i32
    %c0_i32_1 = arith.constant 0 : i32
    return %c0_i32, %c0_i32_0 : i32, i32
  }
  func.func @transform_4(%arg0: i32, %arg1: i32, %arg2: i32) -> (i32, i32) {
    %c0_i32 = arith.constant 0 : i32
    %c0_i32_0 = arith.constant 0 : i32
    %c0_i32_1 = arith.constant 0 : i32
    return %c0_i32, %c0_i32_0 : i32, i32
  }
  func.func @transform_5(%arg0: i32, %arg1: i32, %arg2: i32) -> (i32, i32) {
    %c0_i32 = arith.constant 0 : i32
    %c0_i32_0 = arith.constant 0 : i32
    %c0_i32_1 = arith.constant 0 : i32
    return %c0_i32, %c0_i32_0 : i32, i32
  }
  func.func @transform_6(%arg0: i32, %arg1: i32, %arg2: i32) -> (i32, i32, i32) {
    %c0_i32 = arith.constant 0 : i32
    %c0_i32_0 = arith.constant 0 : i32
    return %arg0, %c0_i32, %arg2 : i32, i32, i32
  }
}

</mosaic_0001>

<bundles_post_ra>
// kernel: tpu_custom_call.1
= control target key start
LH: loop header
LB: loop body
LE: loop exit
PB: predicated region body
PF: predicated region fallthrough
CT: control target
= control target key end

     0   :  { %11 = vsyncpa [#allocation3], 0  ;;  %s3702_s0 = inlined_call_operand.vmem [shape: bf16[2,36,256], index: 0, kind: input, shape index: {}]   ;;  %s3703_s1 = inlined_call_operand.vmem [shape: bf16[128,36], index: 1, kind: input, shape index: {}]   ;;  %s3704_s2 = inlined_call_operand.vmem [shape: f32[16,128], index: 2, kind: input, shape index: {}]   ;;  %s3705_s3 = inlined_call_operand.vmem [shape: f32[128,16], index: 3, kind: input, shape index: {}]   ;;  %s3706_s4 = inlined_call_operand.vmem [shape: f32[128,1], index: 4, kind: input, shape index: {}]   ;;  %s3707_s5 = inlined_call_operand.vmem [shape: f32[128,1], index: 5, kind: input, shape index: {}]   ;;  %s3708_s6 = inlined_call_operand.hbm [shape: bf16[2,128,256], index: 6, kind: output, shape index: {}]  }
   0x1   :  { %13 = vsyncpa [#allocation3 + $0x1], 0  ;;  %s2960_s21 = smov 0   ;;  %s2962_s22 = smov 0  }
   0x2   :  { %s2964_s23 = smov 0   ;;  %s2966_s24 = smov 0  }
   0x3   :  { %s2968_s25 = smov 0   ;;  %s2970_s26 = smov 0  }
   0x4 LB: > { %s2066_s27 = sadd.s32 4294967295, %s2918_s26   ;;  %s2067_s28 = sadd.s32 4294967294, %s2918_s26   ;;  %s2918_s26 = sphi %s2970_s26, %s19_s26   ;;  %s2914_s25 = sphi %s2968_s25, %s3718_s25   ;;  %s2910_s24 = sphi %s2966_s24, %s3717_s24   ;;  %s2906_s23 = sphi %s2964_s23, %s3716_s23   ;;  %s2902_s22 = sphi %s2962_s22, %s3715_s22   ;;  %s2898_s21 = sphi %s2960_s21, %s3714_s21  }
   0x5   : > { %s38_s29 = sadd.s32 1, %s2914_s25  ;;  %s180_s30 = sadd.s32 1, %s2906_s23 }
   0x6   : > { %p40_p0 = scmp.ge.s32.totalorder %s38_s29, 2  ;;  %p190_p1 = scmp.ne.s32.totalorder %s2906_s23, %s2902_s22 }
   0x7   : > { %p191_p2 = scmp.eq.s32.totalorder %s2066_s27, 1  ;;  %p196_p3 = scmp.ne.s32.totalorder %s2902_s22, %s2898_s21 }
   0x8   : > { %s3720_s29 = smov (%p40_p0, %s38_s29), 0  ;;  %p197_p5 = scmp.eq.s32.totalorder %s2067_s28, 1 }
   0x9   : > { %p3000_p4 = por %p191_p2, %p190_p1  ;;  %s175_s8 = ssub.s32 %s2914_s25, %s3720_s29 }
   0xa   : > { %p2070_p6 = scmp.ge.s32.totalorder %s2918_s26, 1  ;;  %p178_p7 = scmp.eq.s32.totalorder %s175_s8, 0 }
   0xb   : > { %p3007_p8 = por %p197_p5, %p196_p3  ;;  %p243_p9 = scmp.lt.s32.totalorder %s2918_s26, 3 }
   0xc   : > { %s3013_s10 = scalar_select %p178_p7, %s2906_s23, %s180_s30  }
   0xd   : > { %p244_p10 = pnand %p2070_p6, %p243_p9 }
   0xf   : > { %247 = sbr.rel (%p244_p10) target bundleno = 1273 (0x4f9), region = 44 }
  0x16   : > { %p278_p11 = scmp.lt.s32.totalorder %s2910_s24, 1  ;;  %v2920_v0 = vmov 0   ;;  %v2921_v3 = vmov 1.0|1.0   ;;  %vm400_vm0 = vcmask 1041408   ;;  %v2700_v10 = vld [vmem:[%s3703_s1] sm:$0xff]  }
  0x17   : > { %439 = vmatprep.mubr.bf16.mxu0 %v2920_v0  ;;  %2691 = vset.pattern.permute.xlu1 %v2920_v0  ;;  %vm375_vm1 = vcmask 293888   ;;  %v2701_v11 = vld [vmem:[%s3703_s1 + $0x8] sm:$0xff]   ;;  %v2702_v12 = vld [vmem:[%s3703_s1 + $0x10] sm:$0xff]   ;;  %v2703_v13 = vld [vmem:[%s3703_s1 + $0x18] sm:$0xff]   ;;  %vm1056_vm2 = vcmask 130048   ;;  %s274_s20 = sand.u32 1, %s2902_s22  }
  0x18   : > { %s279_s11 = scalar_select %p278_p11, %s2910_s24, 1  ;;  %2690 = vset.pattern.permute.xlu0 %v2920_v0  ;;  %2524 = vmatprep.subr.bf16.mxu1 %v2921_v3  ;;  %v2704_v14 = vld [vmem:[%s3703_s1 + $0x20] sm:$0xff]   ;;  %v2705_v15 = vld [vmem:[%s3703_s1 + $0x28] sm:$0xff]   ;;  %v2706_v16 = vld [vmem:[%s3703_s1 + $0x30] sm:$0xff]  }
  0x19   : > { %2525 = vmatpush3.bf16.msra.mxu1 %v2921_v3  ;;  %v2707_v17 = vld [vmem:[%s3703_s1 + $0x38] sm:$0xff]   ;;  %s2071_s27 = sshll.u32 %s274_s20, 7  ;;  %s2165_s30 = sshll.u32 %s2910_s24, 11 }
  0x1a   : > { %s2630_s12 = smul.u32 40, %s279_s11  ;;  %2526 = vmatprep.subr.bf16.mxu1 %v2921_v3  ;;  %s3534_s28 = scalar_lea.vmem [#allocation2], %s2071_s27 }
  0x1b   : > { %s1987_s8 = sshll.u32 %s3534_s28, 4  ;;  %s3648_s13 = scalar_lea.hbm %s3708_s6, %s2165_s30  ;;  %s3650_s8 = int_to_ptr.vmem [resolvable:$true] %s1987_s8 }
  0x1c   : > { %s285_s15 = scalar_lea.vmem %s3702_s0, %s2630_s12  ;;  %s3656_s24 = scalar_lea.sflag [#allocation3], %s274_s20 }
  0x1d   : > { %v2692_v1 = vld [vmem:[%s285_s15 + $0x4] ss:$8 sps:$4 sm:$0xff]   ;;  %v2694_v2 = vld [vmem:[%s285_s15] ss:$8 sps:$4 sm:$0xff]   ;;  %v2695_v4 = vld [vmem:[%s285_s15 + $0x14] ss:$8 sps:$4 sm:$0xff]   ;;  %2527 = vmatpush3.bf16.msra.mxu1 %v2921_v3 }
  0x1e   : > { %407 = vmatprep.subr.bf16.mxu0 %v2692_v1  ;;  %v309_v5 = vld [vmem:[%s285_s15 + $0x20] sm:$0x33]  ;;  %v2697_v6 = vld [vmem:[%s285_s15 + $0x10] ss:$8 sps:$4 sm:$0xff]   ;;  %2528 = vmatprep.subr.bf16.mxu1 %v2921_v3  ;;  %s2840_s14 = scalar_lea.vmem %s3650_s8, 2048  ;;  %s2922_s15 = smov [#allocation2]  }
  0x1f   : > { %408 = vmatpush1.bf16.msra.mxu0 %v2694_v2  ;;  %v2086_v7 = vcombine.high %v309_v5, %v309_v5  ;;  %v2085_v8 = vcombine.low %v309_v5, %v309_v5  ;;  %p2841_p12 = scmp.ne.s32.totalorder %s3650_s8, %s2840_s14  ;;  %s2844_s16 = sshll.u32 %s2922_s15, 4  ;;  %s2845_s16 = int_to_ptr.vmem [resolvable:$false] %s2844_s16 }
  0x20   : > { %409 = vmatprep.subr.bf16.mxu0 %v2695_v4  ;;  %s2846_s17 = scalar_lea.vmem %s2845_s16, 4096  ;;  %p2847_p1 = scmp.lt.s32.totalorder %s3650_s8, %s2845_s16 }
  0x21   : > { %v402_v9 = vsel %vm400_vm0, %v2085_v8, 0  ;;  %2529 = vmatpush3.bf16.msra.mxu1 %v2921_v3  ;;  %p2842_p13 = pnand %p2841_p12, %p3000_p4  ;;  %p2848_p2 = scmp.lt.s32.totalorder %s2846_s17, %s2840_s14 }
  0x22   : > { %2530 = vmatprep.subr.bf16.mxu1 %v2921_v3 }
  0x23   : > { %410 = vmatpush1.bf16.msra.mxu0 %v2697_v6  ;;  %p2843_p0 = pneg %p2842_p13  ;;  %p2849_p3 = por %p2848_p2, %p2847_p1 }
  0x24   : > { %2087 = vmatprep.subr.msk.bf16.mxu0 %vm400_vm0, %v2086_v7 }
  0x25   : > { %2531 = vmatpush3.bf16.msra.mxu1 %v2921_v3  ;;  %p2850_p5 = pnand %p2849_p3, %p2843_p0 }
  0x26   : > { %2532 = vmatprep.subr.bf16.mxu1 %v2921_v3 }
  0x27   : > { %412 = vmatpush1.bf16.msra.mxu0 %v402_v9 }
  0x28   : > { %2540 = vmatprep.subr.bf16.mxu0 %v2921_v3 }
  0x29   : > { %2533 = vmatpush3.bf16.msra.mxu1 %v2921_v3 }
  0x2a   : > { %2088 = vmatmul.mubr.msk.bf16.vlgmr.msra.gmra.mrb[0].mxu0 %vm375_vm1, %v2700_v10  ;;  %2534 = vmatprep.subr.bf16.mxu1 %v2921_v3 }
  0x2b   : > { %449 = vmatprep.mubr.bf16.mxu0 %v2920_v0  ;;  %2541 = vmatpush3.bf16.msra.mxu0 %v2921_v3 }
  0x2c   : > { %2542 = vmatprep.subr.bf16.mxu0 %v2921_v3 }
  0x2d   : > { %2535 = vmatpush3.bf16.msra.mxu1 %v2921_v3 }
  0x2e   : > { %2536 = vmatprep.subr.bf16.mxu1 %v2921_v3 }
  0x2f   : > { %2543 = vmatpush3.bf16.msra.mxu0 %v2921_v3 }
  0x30   : > { %2544 = vmatprep.subr.bf16.mxu0 %v2921_v3 }
  0x31   : > { %2537 = vmatpush3.bf16.msra.mxu1 %v2921_v3 }
  0x32   : > { %2089 = vmatmul.mubr.msk.bf16.gmra.mrb[4].mxu0 %vm375_vm1, %v2701_v11  ;;  %2538 = vmatprep.subr.bf16.mxu1 %v2921_v3 }
  0x33   : > { %459 = vmatprep.mubr.bf16.mxu0 %v2920_v0  ;;  %2545 = vmatpush3.bf16.msra.mxu0 %v2921_v3 }
  0x34   : > { %2546 = vmatprep.subr.bf16.mxu0 %v2921_v3 }
  0x35   : > { %2539 = vmatpush3.bf16.msra.mxu1 %v2921_v3 }
  0x37   : > { %2547 = vmatpush3.bf16.msra.mxu0 %v2921_v3 }
  0x38   : > { %2548 = vmatprep.subr.bf16.mxu0 %v2921_v3 }
  0x3a   : > { %2090 = vmatmul.mubr.msk.bf16.gmra.mrb[8].mxu0 %vm375_vm1, %v2702_v12 }
  0x3b   : > { %469 = vmatprep.mubr.bf16.mxu0 %v2920_v0  ;;  %2549 = vmatpush3.bf16.msra.mxu0 %v2921_v3 }
  0x3c   : > { %2550 = vmatprep.subr.bf16.mxu0 %v2921_v3 }
  0x3f   : > { %2551 = vmatpush3.bf16.msra.mxu0 %v2921_v3 }
  0x40   : > { %2552 = vmatprep.subr.bf16.mxu0 %v2921_v3 }
  0x42   : > { %2091 = vmatmul.mubr.msk.bf16.gmra.mrb[12].mxu0 %vm375_vm1, %v2703_v13 }
  0x43   : > { %479 = vmatprep.mubr.bf16.mxu0 %v2920_v0  ;;  %2553 = vmatpush3.bf16.msra.mxu0 %v2921_v3 }
  0x44   : > { %2554 = vmatprep.subr.bf16.mxu0 %v2921_v3 }
  0x47   : > { %2555 = vmatpush3.bf16.msra.mxu0 %v2921_v3 }
  0x4a   : > { %2092 = vmatmul.mubr.msk.bf16.gmra.mrb[16].mxu0 %vm375_vm1, %v2704_v14 }
  0x4b   : > { %489 = vmatprep.mubr.bf16.mxu0 %v2920_v0 }
  0x52   : > { %2093 = vmatmul.mubr.msk.bf16.gmra.mrb[20].mxu0 %vm375_vm1, %v2705_v15 }
  0x53   : > { %499 = vmatprep.mubr.bf16.mxu0 %v2920_v0 }
  0x5a   : > { %2094 = vmatmul.mubr.msk.bf16.gmra.mrb[24].mxu0 %vm375_vm1, %v2706_v16 }
  0x5b   : > { %509 = vmatprep.mubr.bf16.mxu0 %v2920_v0 }
  0x62   : > { %2095 = vmatmul.mubr.msk.bf16.gmra.mrb[28].mxu0 %vm375_vm1, %v2707_v17 }
  0xfd   : > { %v3062_v18 = vpop.f32.mrb[0].mxu0 }
  0xfe   : > { %v3064_v19 = vpop.f32.mrb[1].mxu0  ;;  %v665_v22 = vmul.f32 %v3062_v18, %v3062_v18 }
  0xff   : > { %v666_v20 = vmul.f32 %v3064_v19, %v3064_v19  ;;  %v3068_v21 = vpop.f32.mrb[2].mxu0  ;;  %584 = vmatprep.mubr.f32.mxu1 %v3064_v19 }
 0x100   : > { %v3073_v23 = vpop.f32.mrb[3].mxu0  ;;  %585 = vmatmul.mubr.f32.vlgmr.msra.gmra.mrb[0].mxu1 %v3062_v18  ;;  %v667_v25 = vmul.f32 %v3068_v21, %v3068_v21 }
 0x101   : > { %v668_v24 = vmul.f32 %v3073_v23, %v3073_v23  ;;  %589 = vmatprep.mubr.f32.mxu1 %v3073_v23  ;;  %761 = vmatprep.mubr.f32.mxu0 %v666_v20  ;;  %v3225_v20 = vld [vmem:[%s3704_s2] sm:$0xff] }
 0x102   : > { %762 = vmatmul.mubr.f32.vlgmr.msra.gmra.mrb[32].mxu0 %v665_v22 }
 0x103   : > { %766 = vmatprep.mubr.f32.mxu0 %v668_v24 }
 0x104   : > { %590 = vmatmul.mubr.f32.gmra.mrb[2].mxu1 %v3068_v21 }
 0x105   : > { %v3082_v26 = vpop.f32.mrb[4].mxu0 }
 0x106   : > { %v3084_v27 = vpop.f32.mrb[5].mxu0  ;;  %767 = vmatmul.mubr.f32.gmra.mrb[34].mxu0 %v667_v25  ;;  %v669_v30 = vmul.f32 %v3082_v26, %v3082_v26 }
 0x107   : > { %v670_v28 = vmul.f32 %v3084_v27, %v3084_v27  ;;  %v3088_v29 = vpop.f32.mrb[6].mxu0  ;;  %594 = vmatprep.mubr.f32.mxu1 %v3084_v27 }
 0x108   : > { %v3093_v31 = vpop.f32.mrb[7].mxu0  ;;  %595 = vmatmul.mubr.f32.gmra.mrb[4].mxu1 %v3082_v26  ;;  %v671_v33 = vmul.f32 %v3088_v29, %v3088_v29 }
 0x109   : > { %v672_v32 = vmul.f32 %v3093_v31, %v3093_v31  ;;  %599 = vmatprep.mubr.f32.mxu1 %v3093_v31  ;;  %771 = vmatprep.mubr.f32.mxu0 %v670_v28 }
 0x10a   : > { %772 = vmatmul.mubr.f32.gmra.mrb[36].mxu0 %v669_v30 }
 0x10b   : > { %776 = vmatprep.mubr.f32.mxu0 %v672_v32 }
 0x10c   : > { %600 = vmatmul.mubr.f32.gmra.mrb[6].mxu1 %v3088_v29 }
 0x10d   : > { %v3102_v34 = vpop.f32.mrb[8].mxu0 }
 0x10e   : > { %v3104_v35 = vpop.f32.mrb[9].mxu0  ;;  %777 = vmatmul.mubr.f32.gmra.mrb[38].mxu0 %v671_v33  ;;  %v673_v38 = vmul.f32 %v3102_v34, %v3102_v34 }
 0x10f   : > { %v674_v36 = vmul.f32 %v3104_v35, %v3104_v35  ;;  %v3108_v37 = vpop.f32.mrb[10].mxu0  ;;  %604 = vmatprep.mubr.f32.mxu1 %v3104_v35 }
 0x110   : > { %v3113_v39 = vpop.f32.mrb[11].mxu0  ;;  %605 = vmatmul.mubr.f32.gmra.mrb[8].mxu1 %v3102_v34  ;;  %v675_v41 = vmul.f32 %v3108_v37, %v3108_v37 }
 0x111   : > { %v676_v40 = vmul.f32 %v3113_v39, %v3113_v39  ;;  %609 = vmatprep.mubr.f32.mxu1 %v3113_v39  ;;  %781 = vmatprep.mubr.f32.mxu0 %v674_v36 }
 0x112   : > { %782 = vmatmul.mubr.f32.gmra.mrb[40].mxu0 %v673_v38 }
 0x113   : > { %786 = vmatprep.mubr.f32.mxu0 %v676_v40 }
 0x114   : > { %610 = vmatmul.mubr.f32.gmra.mrb[10].mxu1 %v3108_v37 }
 0x115   : > { %v3122_v42 = vpop.f32.mrb[12].mxu0 }
 0x116   : > { %v3124_v43 = vpop.f32.mrb[13].mxu0  ;;  %787 = vmatmul.mubr.f32.gmra.mrb[42].mxu0 %v675_v41  ;;  %v677_v46 = vmul.f32 %v3122_v42, %v3122_v42 }
 0x117   : > { %v678_v44 = vmul.f32 %v3124_v43, %v3124_v43  ;;  %v3128_v45 = vpop.f32.mrb[14].mxu0  ;;  %614 = vmatprep.mubr.f32.mxu1 %v3124_v43 }
 0x118   : > { %v3133_v47 = vpop.f32.mrb[15].mxu0  ;;  %615 = vmatmul.mubr.f32.gmra.mrb[12].mxu1 %v3122_v42  ;;  %v679_v49 = vmul.f32 %v3128_v45, %v3128_v45 }
 0x119   : > { %v680_v48 = vmul.f32 %v3133_v47, %v3133_v47  ;;  %619 = vmatprep.mubr.f32.mxu1 %v3133_v47  ;;  %791 = vmatprep.mubr.f32.mxu0 %v678_v44 }
 0x11a   : > { %792 = vmatmul.mubr.f32.gmra.mrb[44].mxu0 %v677_v46 }
 0x11b   : > { %796 = vmatprep.mubr.f32.mxu0 %v680_v48 }
 0x11c   : > { %620 = vmatmul.mubr.f32.gmra.mrb[14].mxu1 %v3128_v45 }
 0x11d   : > { %v3142_v50 = vpop.f32.mrb[16].mxu0 }
 0x11e   : > { %v3144_v51 = vpop.f32.mrb[17].mxu0  ;;  %797 = vmatmul.mubr.f32.gmra.mrb[46].mxu0 %v679_v49  ;;  %v681_v54 = vmul.f32 %v3142_v50, %v3142_v50 }
 0x11f   : > { %v682_v52 = vmul.f32 %v3144_v51, %v3144_v51  ;;  %v3148_v53 = vpop.f32.mrb[18].mxu0  ;;  %624 = vmatprep.mubr.f32.mxu1 %v3144_v51 }
 0x120   : > { %v3153_v55 = vpop.f32.mrb[19].mxu0  ;;  %625 = vmatmul.mubr.f32.gmra.mrb[16].mxu1 %v3142_v50  ;;  %v683_v57 = vmul.f32 %v3148_v53, %v3148_v53 }
 0x121   : > { %v684_v56 = vmul.f32 %v3153_v55, %v3153_v55  ;;  %629 = vmatprep.mubr.f32.mxu1 %v3153_v55  ;;  %801 = vmatprep.mubr.f32.mxu0 %v682_v52 }
 0x122   : > { %802 = vmatmul.mubr.f32.gmra.mrb[48].mxu0 %v681_v54 }
 0x123   : > { %806 = vmatprep.mubr.f32.mxu0 %v684_v56 }
 0x124   : > { %630 = vmatmul.mubr.f32.gmra.mrb[18].mxu1 %v3148_v53 }
 0x125   : > { %v3162_v58 = vpop.f32.mrb[20].mxu0 }
 0x126   : > { %v3164_v59 = vpop.f32.mrb[21].mxu0  ;;  %807 = vmatmul.mubr.f32.gmra.mrb[50].mxu0 %v683_v57  ;;  %v685_v62 = vmul.f32 %v3162_v58, %v3162_v58 }
 0x127   : > { %v686_v60 = vmul.f32 %v3164_v59, %v3164_v59  ;;  %v3168_v61 = vpop.f32.mrb[22].mxu0  ;;  %634 = vmatprep.mubr.f32.mxu1 %v3164_v59 }
 0x128   : > { %v3173_v63 = vpop.f32.mrb[23].mxu0  ;;  %635 = vmatmul.mubr.f32.gmra.mrb[20].mxu1 %v3162_v58  ;;  %v687_v1 = vmul.f32 %v3168_v61, %v3168_v61 }
 0x129   : > { %v688_v0 = vmul.f32 %v3173_v63, %v3173_v63  ;;  %639 = vmatprep.mubr.f32.mxu1 %v3173_v63  ;;  %811 = vmatprep.mubr.f32.mxu0 %v686_v60 }
 0x12a   : > { %812 = vmatmul.mubr.f32.gmra.mrb[52].mxu0 %v685_v62 }
 0x12b   : > { %816 = vmatprep.mubr.f32.mxu0 %v688_v0 }
 0x12c   : > { %640 = vmatmul.mubr.f32.gmra.mrb[22].mxu1 %v3168_v61 }
 0x12d   : > { %v3182_v2 = vpop.f32.mrb[24].mxu0 }
 0x12e   : > { %v3184_v3 = vpop.f32.mrb[25].mxu0  ;;  %817 = vmatmul.mubr.f32.gmra.mrb[54].mxu0 %v687_v1  ;;  %v689_v6 = vmul.f32 %v3182_v2, %v3182_v2 }
 0x12f   : > { %3712 = vst [vmem:[#allocation5_spill] sm:$0xff] %v3184_v3  ;;  %v690_v4 = vmul.f32 %v3184_v3, %v3184_v3  ;;  %v3188_v5 = vpop.f32.mrb[26].mxu0  ;;  %644 = vmatprep.mubr.f32.mxu1 %v3184_v3 }
 0x130   : > { %v3193_v7 = vpop.f32.mrb[27].mxu0  ;;  %645 = vmatmul.mubr.f32.gmra.mrb[24].mxu1 %v3182_v2  ;;  %v691_v9 = vmul.f32 %v3188_v5, %v3188_v5 }
 0x131   : > { %v692_v8 = vmul.f32 %v3193_v7, %v3193_v7  ;;  %649 = vmatprep.mubr.f32.mxu1 %v3193_v7  ;;  %821 = vmatprep.mubr.f32.mxu0 %v690_v4 }
 0x132   : > { %822 = vmatmul.mubr.f32.gmra.mrb[56].mxu0 %v689_v6 }
 0x133   : > { %826 = vmatprep.mubr.f32.mxu0 %v692_v8 }
 0x134   : > { %650 = vmatmul.mubr.f32.gmra.mrb[26].mxu1 %v3188_v5 }
 0x135   : > { %v3202_v10 = vpop.f32.mrb[28].mxu0 }
 0x136   : > { %v3204_v11 = vpop.f32.mrb[29].mxu0  ;;  %827 = vmatmul.mubr.f32.gmra.mrb[58].mxu0 %v691_v9  ;;  %v693_v14 = vmul.f32 %v3202_v10, %v3202_v10 }
 0x137   : > { %v694_v12 = vmul.f32 %v3204_v11, %v3204_v11  ;;  %v3208_v13 = vpop.f32.mrb[30].mxu0  ;;  %654 = vmatprep.mubr.f32.mxu1 %v3204_v11 }
 0x138   : > { %v3213_v15 = vpop.f32.mrb[31].mxu0  ;;  %655 = vmatmul.mubr.f32.gmra.mrb[28].mxu1 %v3202_v10  ;;  %v695_v17 = vmul.f32 %v3208_v13, %v3208_v13 }
 0x139   : > { %v696_v16 = vmul.f32 %v3213_v15, %v3213_v15  ;;  %659 = vmatprep.mubr.f32.mxu1 %v3213_v15  ;;  %831 = vmatprep.mubr.f32.mxu0 %v694_v12 }
 0x13a   : > { %832 = vmatmul.mubr.f32.gmra.mrb[60].mxu0 %v693_v14 }
 0x13b   : > { %836 = vmatprep.mubr.f32.mxu0 %v696_v16 }
 0x13c   : > { %660 = vmatmul.mubr.f32.gmra.mrb[30].mxu1 %v3208_v13 }
 0x13d   : > { %2430 = vmatprep.mubr.f32.mxu1 %v3225_v20 }
 0x13e   : > { %837 = vmatmul.mubr.f32.gmra.mrb[62].mxu0 %v695_v17 }
 0x1d3   : > { %v2198_v22 = vpop.f32.mrb[0].mxu1 }
 0x1d4   : > { %v2199_v24 = vpop.f32.mrb[1].mxu1 }
 0x1d5   : > { %v2200_v25 = vadd.f32 %v2199_v24, %v2198_v22  ;;  %v2278_v28 = vpop.f32.mrb[32].mxu0 }
 0x1d6   : > { %v2279_v30 = vpop.f32.mrb[33].mxu0 }
 0x1d7   : > { %v2280_v32 = vadd.f32 %v2279_v30, %v2278_v28  ;;  %v2201_v33 = vpop.f32.mrb[2].mxu1 }
 0x1d8   : > { %v2202_v36 = vpop.f32.mrb[3].mxu1 }
 0x1d9   : > { %v2203_v38 = vadd.f32 %v2202_v36, %v2201_v33  ;;  %v2281_v40 = vpop.f32.mrb[34].mxu0 }
 0x1da   : > { %v2282_v41 = vpop.f32.mrb[35].mxu0 }
 0x1db   : > { %v2556_v44 = vpack.c.bf16 %v2203_v38, %v2200_v25  ;;  %v2283_v46 = vadd.f32 %v2282_v41, %v2281_v40  ;;  %v2204_v48 = vpop.f32.mrb[4].mxu1 }
 0x1dc   : > { %v2205_v49 = vpop.f32.mrb[5].mxu1 }
 0x1dd   : > { %v3228_v52 = vpack.c.bf16 %v2283_v46, %v2280_v32  ;;  %v2206_v54 = vadd.f32 %v2205_v49, %v2204_v48  ;;  %v2284_v56 = vpop.f32.mrb[36].mxu0  ;;  %2557 = vmatprep.subr.bf16.mxu1 %v2556_v44 }
 0x1de   : > { %v2285_v57 = vpop.f32.mrb[37].mxu0  ;;  %2559 = vmatpush3.bf16.msra.mxu1 %v2556_v44 }
 0x1df   : > { %v2286_v60 = vadd.f32 %v2285_v57, %v2284_v56  ;;  %v2207_v62 = vpop.f32.mrb[6].mxu1 }
 0x1e0   : > { %v2208_v0 = vpop.f32.mrb[7].mxu1 }
 0x1e1   : > { %v2209_v1 = vadd.f32 %v2208_v0, %v2207_v62  ;;  %v2287_v4 = vpop.f32.mrb[38].mxu0 }
 0x1e2   : > { %v2288_v6 = vpop.f32.mrb[39].mxu0 }
 0x1e3   : > { %v2560_v8 = vpack.c.bf16 %v2209_v1, %v2206_v54  ;;  %v2289_v9 = vadd.f32 %v2288_v6, %v2287_v4  ;;  %v2210_v12 = vpop.f32.mrb[8].mxu1 }
 0x1e4   : > { %v2211_v14 = vpop.f32.mrb[9].mxu1 }
 0x1e5   : > { %v3230_v16 = vpack.c.bf16 %v2289_v9, %v2286_v60  ;;  %v2212_v17 = vadd.f32 %v2211_v14, %v2210_v12  ;;  %v2290_v22 = vpop.f32.mrb[40].mxu0  ;;  %2561 = vmatprep.subr.bf16.mxu1 %v2560_v8 }
 0x1e6   : > { %v2291_v24 = vpop.f32.mrb[41].mxu0  ;;  %2563 = vmatpush3.bf16.msra.mxu1 %v2560_v8 }
 0x1e7   : > { %v2292_v25 = vadd.f32 %v2291_v24, %v2290_v22  ;;  %v2213_v28 = vpop.f32.mrb[10].mxu1 }
 0x1e8   : > { %v2214_v30 = vpop.f32.mrb[11].mxu1 }
 0x1e9   : > { %v2215_v32 = vadd.f32 %v2214_v30, %v2213_v28  ;;  %v2293_v33 = vpop.f32.mrb[42].mxu0 }
 0x1ea   : > { %v2294_v36 = vpop.f32.mrb[43].mxu0 }
 0x1eb   : > { %v2564_v38 = vpack.c.bf16 %v2215_v32, %v2212_v17  ;;  %v2295_v40 = vadd.f32 %v2294_v36, %v2293_v33  ;;  %v2216_v41 = vpop.f32.mrb[12].mxu1 }
 0x1ec   : > { %v2217_v44 = vpop.f32.mrb[13].mxu1 }
 0x1ed   : > { %v3232_v46 = vpack.c.bf16 %v2295_v40, %v2292_v25  ;;  %v2218_v48 = vadd.f32 %v2217_v44, %v2216_v41  ;;  %v2296_v49 = vpop.f32.mrb[44].mxu0  ;;  %2565 = vmatprep.subr.bf16.mxu1 %v2564_v38 }
 0x1ee   : > { %v2297_v54 = vpop.f32.mrb[45].mxu0  ;;  %2567 = vmatpush3.bf16.msra.mxu1 %v2564_v38 }
 0x1ef   : > { %v2298_v56 = vadd.f32 %v2297_v54, %v2296_v49  ;;  %v2219_v57 = vpop.f32.mrb[14].mxu1 }
 0x1f0   : > { %v2220_v60 = vpop.f32.mrb[15].mxu1 }
 0x1f1   : > { %v2221_v62 = vadd.f32 %v2220_v60, %v2219_v57  ;;  %v2299_v0 = vpop.f32.mrb[46].mxu0 }
 0x1f2   : > { %v2300_v1 = vpop.f32.mrb[47].mxu0 }
 0x1f3   : > { %v2568_v4 = vpack.c.bf16 %v2221_v62, %v2218_v48  ;;  %v2301_v6 = vadd.f32 %v2300_v1, %v2299_v0  ;;  %v2222_v8 = vpop.f32.mrb[16].mxu1 }
 0x1f4   : > { %v2223_v9 = vpop.f32.mrb[17].mxu1 }
 0x1f5   : > { %v3234_v12 = vpack.c.bf16 %v2301_v6, %v2298_v56  ;;  %v2224_v14 = vadd.f32 %v2223_v9, %v2222_v8  ;;  %v2302_v17 = vpop.f32.mrb[48].mxu0  ;;  %2569 = vmatprep.subr.bf16.mxu1 %v2568_v4 }
 0x1f6   : > { %v2303_v22 = vpop.f32.mrb[49].mxu0  ;;  %2571 = vmatpush3.bf16.msra.mxu1 %v2568_v4 }
 0x1f7   : > { %v2304_v24 = vadd.f32 %v2303_v22, %v2302_v17  ;;  %v2225_v25 = vpop.f32.mrb[18].mxu1 }
 0x1f8   : > { %v2226_v28 = vpop.f32.mrb[19].mxu1 }
 0x1f9   : > { %v2227_v30 = vadd.f32 %v2226_v28, %v2225_v25  ;;  %v2305_v32 = vpop.f32.mrb[50].mxu0 }
 0x1fa   : > { %v2306_v33 = vpop.f32.mrb[51].mxu0 }
 0x1fb   : > { %v2572_v36 = vpack.c.bf16 %v2227_v30, %v2224_v14  ;;  %v2307_v38 = vadd.f32 %v2306_v33, %v2305_v32  ;;  %v2228_v40 = vpop.f32.mrb[20].mxu1 }
 0x1fc   : > { %v2229_v41 = vpop.f32.mrb[21].mxu1 }
 0x1fd   : > { %v2604_v44 = vpack.c.bf16 %v2307_v38, %v2304_v24  ;;  %v2230_v48 = vadd.f32 %v2229_v41, %v2228_v40  ;;  %v2308_v49 = vpop.f32.mrb[52].mxu0  ;;  %2573 = vmatprep.subr.bf16.mxu1 %v2572_v36 }
 0x1fe   : > { %v2309_v54 = vpop.f32.mrb[53].mxu0  ;;  %2575 = vmatpush3.bf16.msra.mxu1 %v2572_v36 }
 0x1ff   : > { %v2310_v56 = vadd.f32 %v2309_v54, %v2308_v49  ;;  %v2231_v57 = vpop.f32.mrb[22].mxu1 }
 0x200   : > { %v2232_v60 = vpop.f32.mrb[23].mxu1 }
 0x201   : > { %v2233_v62 = vadd.f32 %v2232_v60, %v2231_v57  ;;  %v2311_v0 = vpop.f32.mrb[54].mxu0 }
 0x202   : > { %v2312_v1 = vpop.f32.mrb[55].mxu0 }
 0x203   : > { %v2576_v4 = vpack.c.bf16 %v2233_v62, %v2230_v48  ;;  %v2313_v6 = vadd.f32 %v2312_v1, %v2311_v0  ;;  %v2234_v8 = vpop.f32.mrb[24].mxu1 }
 0x204   : > { %v2235_v9 = vpop.f32.mrb[25].mxu1 }
 0x205   : > { %v2608_v14 = vpack.c.bf16 %v2313_v6, %v2310_v56  ;;  %v2236_v17 = vadd.f32 %v2235_v9, %v2234_v8  ;;  %v2314_v22 = vpop.f32.mrb[56].mxu0  ;;  %2577 = vmatprep.subr.bf16.mxu1 %v2576_v4 }
 0x206   : > { %v2315_v24 = vpop.f32.mrb[57].mxu0  ;;  %2579 = vmatpush3.bf16.msra.mxu1 %v2576_v4 }
 0x207   : > { %v2316_v25 = vadd.f32 %v2315_v24, %v2314_v22  ;;  %v2237_v28 = vpop.f32.mrb[26].mxu1  ;;  %v844_v24 = vld [vmem:[%s3705_s3 + $0x10] sm:$0xff] }
 0x208   : > { %v2238_v30 = vpop.f32.mrb[27].mxu1 }
 0x209   : > { %v2239_v32 = vadd.f32 %v2238_v30, %v2237_v28  ;;  %v2317_v33 = vpop.f32.mrb[58].mxu0  ;;  %v846_v28 = vld [vmem:[%s3705_s3 + $0x20] sm:$0xff]  ;;  %v847_v30 = vld [vmem:[%s3705_s3 + $0x28] sm:$0xff] }
 0x20a   : > { %v2318_v36 = vpop.f32.mrb[59].mxu0 }
 0x20b   : > { %v2580_v38 = vpack.c.bf16 %v2239_v32, %v2236_v17  ;;  %v2319_v40 = vadd.f32 %v2318_v36, %v2317_v33  ;;  %v2240_v41 = vpop.f32.mrb[28].mxu1  ;;  %v859_v17 = vld [vmem:[%s3704_s2 + $0x8] sm:$0xff]  ;;  %v848_v32 = vld [vmem:[%s3705_s3 + $0x30] sm:$0xff]  ;;  %v849_v33 = vld [vmem:[%s3705_s3 + $0x38] sm:$0xff] }
 0x20c   : > { %v2241_v49 = vpop.f32.mrb[29].mxu1  ;;  %v850_v36 = vld [vmem:[%s3705_s3 + $0x40] sm:$0xff] }
 0x20d   : > { %v2612_v48 = vpack.c.bf16 %v2319_v40, %v2316_v25  ;;  %v2242_v54 = vadd.f32 %v2241_v49, %v2240_v41  ;;  %v2320_v57 = vpop.f32.mrb[60].mxu0  ;;  %2581 = vmatprep.subr.bf16.mxu1 %v2580_v38  ;;  %v845_v25 = vld [vmem:[%s3705_s3 + $0x18] sm:$0xff]  ;;  %v852_v40 = vld [vmem:[%s3705_s3 + $0x50] sm:$0xff]  ;;  %v854_v49 = vld [vmem:[%s3705_s3 + $0x60] sm:$0xff] }
 0x20e   : > { %v2321_v56 = vpop.f32.mrb[61].mxu0  ;;  %2583 = vmatpush3.bf16.msra.mxu1 %v2580_v38  ;;  %v851_v38 = vld [vmem:[%s3705_s3 + $0x48] sm:$0xff]  ;;  %v853_v41 = vld [vmem:[%s3705_s3 + $0x58] sm:$0xff] }
 0x20f   : > { %v2322_v60 = vadd.f32 %v2321_v56, %v2320_v57  ;;  %v2243_v62 = vpop.f32.mrb[30].mxu1  ;;  %v856_v57 = vld [vmem:[%s3705_s3 + $0x70] sm:$0xff] }
 0x210   : > { %v2244_v0 = vpop.f32.mrb[31].mxu1 }
 0x211   : > { %v2245_v1 = vadd.f32 %v2244_v0, %v2243_v62  ;;  %v2323_v4 = vpop.f32.mrb[62].mxu0 }
 0x212   : > { %v2324_v6 = vpop.f32.mrb[63].mxu0 }
 0x213   : > { %v2584_v8 = vpack.c.bf16 %v2245_v1, %v2242_v54  ;;  %v2325_v9 = vadd.f32 %v2324_v6, %v2323_v4  ;;  %v857_v6 = vld [vmem:[%s3705_s3 + $0x78] sm:$0xff] }
 0x215   : > { %v2616_v22 = vpack.c.bf16 %v2325_v9, %v2322_v60  ;;  %2585 = vmatprep.subr.bf16.mxu1 %v2584_v8 }
 0x216   : > { %2587 = vmatpush3.bf16.msra.mxu1 %v2584_v8 }
 0x217   : > { %2589 = vmatprep.subr.bf16.mxu1 %v3228_v52 }
 0x219   : > { %2431 = vmatmul.mubr.f32.vlgmr.msra.gmra.mrb[32].mxu1 %v859_v17 }
 0x21a   : > { %2591 = vmatpush3.bf16.msra.mxu1 %v3228_v52  ;;  %2465 = vmatprep.mubr.f32.mxu1 %v3225_v20  ;;  %v842_v20 = vld [vmem:[%s3705_s3] sm:$0xff] }
 0x21b   : > { %2593 = vmatprep.subr.bf16.mxu1 %v3230_v16  ;;  %2500 = vmatprep.mubr.msk.f32.mxu0 %vm1056_vm2, %v842_v20 }
 0x21e   : > { %2595 = vmatpush3.bf16.msra.mxu1 %v3230_v16 }
 0x21f   : > { %2597 = vmatprep.subr.bf16.mxu1 %v3232_v46 }
 0x222   : > { %2599 = vmatpush3.bf16.msra.mxu1 %v3232_v46 }
 0x223   : > { %2601 = vmatprep.subr.bf16.mxu1 %v3234_v12 }
 0x226   : > { %2603 = vmatpush3.bf16.msra.mxu1 %v3234_v12 }
 0x227   : > { %2605 = vmatprep.subr.bf16.mxu1 %v2604_v44 }
 0x22a   : > { %2607 = vmatpush3.bf16.msra.mxu1 %v2604_v44 }
 0x22b   : > { %2609 = vmatprep.subr.bf16.mxu1 %v2608_v14 }
 0x22e   : > { %2611 = vmatpush3.bf16.msra.mxu1 %v2608_v14  ;;  %v843_v14 = vld [vmem:[%s3705_s3 + $0x8] sm:$0xff] }
 0x22f   : > { %2613 = vmatprep.subr.bf16.mxu1 %v2612_v48 }
 0x232   : > { %2615 = vmatpush3.bf16.msra.mxu1 %v2612_v48  ;;  %v855_v48 = vld [vmem:[%s3705_s3 + $0x68] sm:$0xff] }
 0x233   : > { %2617 = vmatprep.subr.bf16.mxu1 %v2616_v22 }
 0x236   : > { %2619 = vmatpush3.bf16.msra.mxu1 %v2616_v22 }
 0x239   : > { %2466 = vmatmul.mubr.f32.vlgmr.msra.gmra.mrb[34].mxu1 %v859_v17 }
 0x23a   : > { %2472 = vmatprep.mubr.msk.f32.mxu1 %vm1056_vm2, %v842_v20 }
 0x2ec   : > { %v2432_v52 = vpop.f32.mrb[32].mxu1 }
 0x2ed   : > { %v1043_v16 = vmul.f32 0.00048828125, %v2432_v52  ;;  %v958_v46 = vpop.f32.mrb[33].mxu1 }
 0x2ee   : > { %v1042_v12 = vmul.f32 0.00048828125, %v958_v46 }
 0x2ef   : > { %v1047_v56 = vmul.f32 %v1043_v16, %v1043_v16 }
 0x2f0   : > { %v2620_v44 = vpack.c.bf16 %v1043_v16, %v1042_v12  ;;  %v1046_v0 = vmul.f32 %v1042_v12, %v1042_v12 }
 0x2f2   : > { %2621 = vmatprep.subr.bf16.mxu1 %v2620_v44 }
 0x2f3   : > { %2623 = vmatpush3.bf16.msra.mxu1 %v2620_v44 }
 0x2f6   : > { %2473 = vmatmul.mubr.msk.f32.vlgmr.msra.gmra.mrb[36].mxu1 %vm1056_vm2, %v843_v14 }
 0x2f7   : > { %2475 = vmatprep.mubr.msk.f32.mxu1 %vm1056_vm2, %v844_v24 }
 0x2fa   : > { %2476 = vmatmul.mubr.msk.f32.gmra.mrb[38].mxu1 %vm1056_vm2, %v845_v25 }
 0x2fb   : > { %2478 = vmatprep.mubr.msk.f32.mxu1 %vm1056_vm2, %v846_v28 }
 0x2fe   : > { %2479 = vmatmul.mubr.msk.f32.gmra.mrb[40].mxu1 %vm1056_vm2, %v847_v30 }
 0x2ff   : > { %2481 = vmatprep.mubr.msk.f32.mxu1 %vm1056_vm2, %v848_v32 }
 0x302   : > { %2482 = vmatmul.mubr.msk.f32.gmra.mrb[42].mxu1 %vm1056_vm2, %v849_v33 }
 0x303   : > { %2484 = vmatprep.mubr.msk.f32.mxu1 %vm1056_vm2, %v850_v36 }
 0x306   : > { %2485 = vmatmul.mubr.msk.f32.gmra.mrb[44].mxu1 %vm1056_vm2, %v851_v38 }
 0x307   : > { %2487 = vmatprep.mubr.msk.f32.mxu1 %vm1056_vm2, %v852_v40 }
 0x30a   : > { %2488 = vmatmul.mubr.msk.f32.gmra.mrb[46].mxu1 %vm1056_vm2, %v853_v41 }
 0x30b   : > { %2490 = vmatprep.mubr.msk.f32.mxu1 %vm1056_vm2, %v854_v49 }
 0x30c   : > { %v2467_v54 = vpop.f32.mrb[34].mxu1 }
 0x30d   : > { %v1045_v60 = vmul.f32 0.00048828125, %v2467_v54  ;;  %v1033_v62 = vpop.f32.mrb[35].mxu1 }
 0x30e   : > { %v1044_v1 = vmul.f32 0.00048828125, %v1033_v62  ;;  %2491 = vmatmul.mubr.msk.f32.gmra.mrb[48].mxu1 %vm1056_vm2, %v855_v48  ;;  %v874_v62 = vld [vmem:[%s3706_s4 + $0x70] sm:$0xff] }
 0x30f   : > { %v1049_v4 = vsub.f32 %v1045_v60, %v1047_v56  ;;  %2493 = vmatprep.mubr.msk.f32.mxu1 %vm1056_vm2, %v856_v57  ;;  %v875_v56 = vld [vmem:[%s3706_s4 + $0x78] sm:$0xff]  ;;  %v860_v60 = vld [vmem:[%s3706_s4] sm:$0xff] }
 0x310   : > { %v1048_v8 = vsub.f32 %v1044_v1, %v1046_v0 }
 0x311   : > { %v1051_v9 = vmax.f32 %v1049_v4, 0.0 }
 0x312   : > { %v1050_v22 = vmax.f32 %v1048_v8, 0.0  ;;  %2494 = vmatmul.mubr.msk.f32.gmra.mrb[50].mxu1 %vm1056_vm2, %v857_v6 }
 0x313   : > { %v1053_v17 = vadd.f32 1e-05, %v1051_v9  ;;  %2521 = vmatprep.mubr.msk.f32.mxu1 %vm1056_vm2, %v856_v57  ;;  %v861_v57 = vld [vmem:[%s3706_s4 + $0x8] sm:$0xff] }
 0x314   : > { %v1052_v20 = vadd.f32 1e-05, %v1050_v22 }
 0x315   : > { %2708 = vrsqrt.f32 %v1053_v17  ;;  %v863_v17 = vld [vmem:[%s3706_s4 + $0x18] sm:$0xff] }
 0x316   : > { %2710 = vrsqrt.f32 %v1052_v20 }
 0x31f   : > { %v2709_v52 = vpop.eup %2708 }
 0x320   : > { %v2711_v16 = vpop.eup %2710 }
 0x321   : > { %v2624_v46 = vpack.c.bf16 %v2709_v52, %v2711_v16 }
 0x323   : > { %2625 = vmatprep.subr.bf16.mxu0 %v2624_v46  ;;  %2628 = vmatprep.subr.bf16.mxu1 %v2624_v46 }
 0x324   : > { %2627 = vmatpush3.bf16.msra.mxu0 %v2624_v46  ;;  %2629 = vmatpush3.bf16.msra.mxu1 %v2624_v46  ;;  %v862_v46 = vld [vmem:[%s3706_s4 + $0x10] sm:$0xff] }
 0x327   : > { %2501 = vmatmul.mubr.msk.f32.vlgmr.msra.gmra.mrb[64].mxu0 %vm1056_vm2, %v843_v14  ;;  %2522 = vmatmul.mubr.msk.f32.vlgmr.msra.gmra.mrb[52].mxu1 %vm1056_vm2, %v857_v6 }
 0x328   : > { %2503 = vmatprep.mubr.msk.f32.mxu0 %vm1056_vm2, %v844_v24 }
 0x32b   : > { %2504 = vmatmul.mubr.msk.f32.gmra.mrb[66].mxu0 %vm1056_vm2, %v845_v25 }
 0x32c   : > { %2506 = vmatprep.mubr.msk.f32.mxu0 %vm1056_vm2, %v846_v28 }
 0x32f   : > { %2507 = vmatmul.mubr.msk.f32.gmra.mrb[68].mxu0 %vm1056_vm2, %v847_v30 }
 0x330   : > { %2509 = vmatprep.mubr.msk.f32.mxu0 %vm1056_vm2, %v848_v32 }
 0x333   : > { %2510 = vmatmul.mubr.msk.f32.gmra.mrb[70].mxu0 %vm1056_vm2, %v849_v33 }
 0x334   : > { %2512 = vmatprep.mubr.msk.f32.mxu0 %vm1056_vm2, %v850_v36 }
 0x337   : > { %2513 = vmatmul.mubr.msk.f32.gmra.mrb[72].mxu0 %vm1056_vm2, %v851_v38 }
 0x338   : > { %2515 = vmatprep.mubr.msk.f32.mxu0 %vm1056_vm2, %v852_v40 }
 0x33b   : > { %2516 = vmatmul.mubr.msk.f32.gmra.mrb[74].mxu0 %vm1056_vm2, %v853_v41 }
 0x33c   : > { %2518 = vmatprep.mubr.msk.f32.mxu0 %vm1056_vm2, %v854_v49 }
 0x33f   : > { %2519 = vmatmul.mubr.msk.f32.gmra.mrb[76].mxu0 %vm1056_vm2, %v855_v48 }
 0x3c9   : > { %v2474_v12 = vpop.f32.mrb[36].mxu1 }
 0x3ca   : > { %v1171_v44 = vpop.f32.mrb[37].mxu1 }
 0x3cd   : > { %v2477_v14 = vpop.f32.mrb[38].mxu1 }
 0x3ce   : > { %v1181_v24 = vpop.f32.mrb[39].mxu1 }
 0x3d1   : > { %v2480_v25 = vpop.f32.mrb[40].mxu1 }
 0x3d2   : > { %v1191_v28 = vpop.f32.mrb[41].mxu1 }
 0x3d5   : > { %v2483_v30 = vpop.f32.mrb[42].mxu1 }
 0x3d6   : > { %v1201_v32 = vpop.f32.mrb[43].mxu1 }
 0x3d9   : > { %v3328_v33 = vpop.f32.mrb[44].mxu1 }
 0x3da   : > { %v3330_v36 = vpop.f32.mrb[45].mxu1 }
 0x3dd   : > { %v3332_v38 = vpop.f32.mrb[46].mxu1 }
 0x3de   : > { %v3334_v40 = vpop.f32.mrb[47].mxu1 }
 0x3e1   : > { %v3336_v41 = vpop.f32.mrb[48].mxu1 }
 0x3e2   : > { %v3338_v49 = vpop.f32.mrb[49].mxu1 }
 0x3e5   : > { %v2495_v48 = vpop.f32.mrb[50].mxu1 }
 0x3e6   : > { %v1241_v54 = vpop.f32.mrb[51].mxu1 }
 0x3fa   : > { %v2502_v0 = vpop.f32.mrb[64].mxu0  ;;  %v2523_v1 = vpop.f32.mrb[52].mxu1 }
 0x3fb   : > { %v1396_v4 = vmul.f32 %v2502_v0, %v861_v57  ;;  %v1410_v6 = vmul.f32 %v2523_v1, %v875_v56  ;;  %v1316_v8 = vpop.f32.mrb[65].mxu0  ;;  %v1386_v9 = vpop.f32.mrb[53].mxu1  ;;  %v877_v1 = vld [vmem:[%s3707_s5 + $0x8] sm:$0xff] }
 0x3fc   : > { %v1395_v22 = vmul.f32 %v1316_v8, %v860_v60  ;;  %v1409_v20 = vmul.f32 %v1386_v9, %v874_v62 }
 0x3fd   : > { %v1412_v52 = vmul.f32 %v2474_v12, %v1396_v4  ;;  %v3355_v16 = vmul.f32 %v2495_v48, %v1410_v6  ;;  %1520 = vperm.xlu1 %2691, %v1410_v6   ;;  %1450 = vperm.xlu0 %2690, %v1396_v4   ;;  %v865_v12 = vld [vmem:[%s3706_s4 + $0x28] sm:$0xff] }
 0x3fe   : > { %v1411_v3 = vmul.f32 %v1395_v22, %v1171_v44  ;;  %v2505_v57 = vpop.f32.mrb[66].mxu0  ;;  %v3360_v56 = vmul.f32 %v1409_v20, %v1241_v54  ;;  %v864_v44 = vld [vmem:[%s3706_s4 + $0x20] sm:$0xff] }
 0x3ff   : > { %v1398_v0 = vmul.f32 %v2505_v57, %v863_v17  ;;  %v1326_v60 = vpop.f32.mrb[67].mxu0  ;;  %v1428_v6 = vsub.f32 %v877_v1, %v1412_v52  ;;  %v876_v17 = vld [vmem:[%s3707_s5] sm:$0xff] }
 0x400   : > { %v1397_v62 = vmul.f32 %v1326_v60, %v862_v46 }
 0x401   : > { %v1414_v48 = vmul.f32 %v2477_v14, %v1398_v0  ;;  %1445 = vperm.xlu0 %2690, %v1395_v22   ;;  %1460 = vperm.xlu1 %2691, %v1398_v0   ;;  %v867_v14 = vld [vmem:[%s3706_s4 + $0x38] sm:$0xff]  ;;  %v1427_v0 = vsub.f32 %v876_v17, %v1411_v3  ;;  %v878_v17 = vld [vmem:[%s3707_s5 + $0x10] sm:$0xff] }
 0x402   : > { %v1413_v54 = vmul.f32 %v1397_v62, %v1181_v24  ;;  %v2508_v4 = vpop.f32.mrb[68].mxu0  ;;  %v866_v24 = vld [vmem:[%s3706_s4 + $0x30] sm:$0xff]  ;;  %v879_v3 = vld [vmem:[%s3707_s5 + $0x18] sm:$0xff] }
 0x403   : > { %v1400_v8 = vmul.f32 %v2508_v4, %v865_v12  ;;  %v1336_v9 = vpop.f32.mrb[69].mxu0 }
 0x404   : > { %v1399_v46 = vmul.f32 %v1336_v9, %v864_v44  ;;  %v869_v44 = vld [vmem:[%s3706_s4 + $0x48] sm:$0xff] }
 0x405   : > { %1515 = vperm.xlu0 %2690, %v1409_v20   ;;  %1562 = vperm.xlu1 %2691, %v1428_v6   ;;  %v1416_v22 = vmul.f32 %v2480_v25, %v1400_v8  ;;  %v868_v25 = vld [vmem:[%s3706_s4 + $0x40] sm:$0xff] }
 0x406   : > { %v1415_v57 = vmul.f32 %v1399_v46, %v1191_v28  ;;  %v2511_v52 = vpop.f32.mrb[70].mxu0 }
 0x407   : > { %v1402_v60 = vmul.f32 %v2511_v52, %v867_v14  ;;  %v1346_v1 = vpop.f32.mrb[71].mxu0 }
 0x408   : > { %v1401_v12 = vmul.f32 %v1346_v1, %v866_v24  ;;  %v1429_v1 = vsub.f32 %v878_v17, %v1413_v54  ;;  %v880_v17 = vld [vmem:[%s3707_s5 + $0x20] sm:$0xff] }
 0x409   : > { %1557 = vperm.xlu0 %2690, %v1427_v0   ;;  %1455 = vperm.xlu1 %2691, %v1397_v62   ;;  %v1418_v4 = vmul.f32 %v2483_v30, %v1402_v60  ;;  %v871_v30 = vld [vmem:[%s3706_s4 + $0x58] sm:$0xff]  ;;  %v870_v62 = vld [vmem:[%s3706_s4 + $0x50] sm:$0xff]  ;;  %v1430_v0 = vsub.f32 %v879_v3, %v1414_v48  ;;  %v881_v3 = vld [vmem:[%s3707_s5 + $0x28] sm:$0xff] }
 0x40a   : > { %v1417_v20 = vmul.f32 %v1401_v12, %v1201_v32  ;;  %v2514_v6 = vpop.f32.mrb[72].mxu0 }
 0x40b   : > { %v1404_v9 = vmul.f32 %v2514_v6, %v869_v44  ;;  %v1356_v28 = vpop.f32.mrb[73].mxu0 }
 0x40c   : > { %v1403_v14 = vmul.f32 %v1356_v28, %v868_v25  ;;  %v873_v28 = vld [vmem:[%s3706_s4 + $0x68] sm:$0xff] }
 0x40d   : > { %1470 = vperm.xlu1 %2691, %v1400_v8   ;;  %1465 = vperm.xlu0 %2690, %v1399_v46   ;;  %v1420_v32 = vmul.f32 %v3328_v33, %v1404_v9  ;;  %v872_v8 = vld [vmem:[%s3706_s4 + $0x60] sm:$0xff] }
 0x40e   : > { %v1419_v24 = vmul.f32 %v1403_v14, %v3330_v36  ;;  %v2517_v52 = vpop.f32.mrb[74].mxu0 }
 0x40f   : > { %v1406_v44 = vmul.f32 %v2517_v52, %v871_v30  ;;  %v1366_v6 = vpop.f32.mrb[75].mxu0  ;;  %v1432_v52 = vsub.f32 %v881_v3, %v1416_v22 }
 0x410   : > { %v1405_v25 = vmul.f32 %v1366_v6, %v870_v62 }
 0x411   : > { %1572 = vperm.xlu1 %2691, %v1430_v0   ;;  %1567 = vperm.xlu0 %2690, %v1429_v1   ;;  %v1422_v33 = vmul.f32 %v3332_v38, %v1406_v44  ;;  %v883_v0 = vld [vmem:[%s3707_s5 + $0x38] sm:$0xff]  ;;  %v882_v1 = vld [vmem:[%s3707_s5 + $0x30] sm:$0xff] }
 0x412   : > { %v1421_v36 = vmul.f32 %v1405_v25, %v3334_v40  ;;  %v2520_v46 = vpop.f32.mrb[76].mxu0  ;;  %v1431_v40 = vsub.f32 %v880_v17, %v1415_v57 }
 0x413   : > { %v1408_v48 = vmul.f32 %v2520_v46, %v873_v28  ;;  %v1376_v54 = vpop.f32.mrb[77].mxu0  ;;  %v890_v28 = vld [vmem:[%s3707_s5 + $0x70] sm:$0xff] }
 0x414   : > { %v1407_v30 = vmul.f32 %v1376_v54, %v872_v8  ;;  %v1441_v8 = vsub.f32 %v890_v28, %v3360_v56 }
 0x415   : > { %1480 = vperm.xlu1 %2691, %v1402_v60   ;;  %1475 = vperm.xlu0 %2690, %v1401_v12   ;;  %v1424_v38 = vmul.f32 %v3336_v41, %v1408_v48  ;;  %v1434_v60 = vsub.f32 %v883_v0, %v1418_v4  ;;  %v1433_v12 = vsub.f32 %v882_v1, %v1417_v20  ;;  %v885_v41 = vld [vmem:[%s3707_s5 + $0x48] sm:$0xff]  ;;  %v887_v4 = vld [vmem:[%s3707_s5 + $0x58] sm:$0xff]  ;;  %v886_v20 = vld [vmem:[%s3707_s5 + $0x50] sm:$0xff] }
 0x416   : > { %v1423_v62 = vmul.f32 %v1407_v30, %v3338_v49  ;;  %v884_v49 = vld [vmem:[%s3707_s5 + $0x40] sm:$0xff]  ;;  %v1436_v22 = vsub.f32 %v885_v41, %v1420_v32 }
 0x417   : > { %v1435_v57 = vsub.f32 %v884_v49, %v1419_v24  ;;  %v888_v32 = vld [vmem:[%s3707_s5 + $0x60] sm:$0xff] }
 0x418   : > { %v1439_v6 = vsub.f32 %v888_v32, %v1423_v62 }
 0x419   : > { %1582 = vperm.xlu1 %2691, %v1432_v52   ;;  %1577 = vperm.xlu0 %2690, %v1431_v40  }
 0x41d   : > { %1490 = vperm.xlu1 %2691, %v1404_v9   ;;  %1485 = vperm.xlu0 %2690, %v1403_v14   ;;  %v1438_v9 = vsub.f32 %v887_v4, %v1422_v33  ;;  %v1437_v14 = vsub.f32 %v886_v20, %v1421_v36 }
 0x421   : > { %1592 = vperm.xlu1 %2691, %v1434_v60   ;;  %1587 = vperm.xlu0 %2690, %v1433_v12  }
 0x425   : > { %1500 = vperm.xlu1 %2691, %v1406_v44   ;;  %1495 = vperm.xlu0 %2690, %v1405_v25   ;;  %v889_v44 = vld [vmem:[%s3707_s5 + $0x68] sm:$0xff]  ;;  %v891_v25 = vld [vmem:[%s3707_s5 + $0x78] sm:$0xff] }
 0x426   : > { %v1440_v24 = vsub.f32 %v889_v44, %v1424_v38  ;;  %v1442_v33 = vsub.f32 %v891_v25, %v3355_v16 }
 0x429   : > { %1602 = vperm.xlu1 %2691, %v1436_v22   ;;  %1597 = vperm.xlu0 %2690, %v1435_v57  }
 0x42d   : > { %1510 = vperm.xlu1 %2691, %v1408_v48   ;;  %1505 = vperm.xlu0 %2690, %v1407_v30  }
 0x431   : > { %1612 = vperm.xlu1 %2691, %v1438_v9   ;;  %1607 = vperm.xlu0 %2690, %v1437_v14  }
 0x435   : > { %1622 = vperm.xlu1 %2691, %v1440_v24   ;;  %1617 = vperm.xlu0 %2690, %v1439_v6  }
 0x439   : > { %1632 = vperm.xlu1 %2691, %v1442_v33   ;;  %1627 = vperm.xlu0 %2690, %v1441_v8  }
 0x47c   : > { %v1521_v36 = vpop.permute.xlu1 %1520  ;;  %v1451_v46 = vpop.permute.xlu0 %1450 }
 0x47d   : > { %v3449_v48 = vmul.f32 %v1521_v36, %v3208_v13  ;;  %v3452_v54 = vmul.f32 %v1521_v36, %v3213_v15  ;;  %v1525_v30 = vmul.f32 %v1451_v46, %v3068_v21  ;;  %v1526_v38 = vmul.f32 %v1451_v46, %v3073_v23 }
 0x480   : > { %v1446_v3 = vpop.permute.xlu0 %1445  ;;  %v1461_v17 = vpop.permute.xlu1 %1460 }
 0x481   : > { %v1523_v15 = vmul.f32 %v1446_v3, %v3062_v18  ;;  %v1524_v0 = vmul.f32 %v1446_v3, %v3064_v19  ;;  %v1529_v20 = vmul.f32 %v1461_v17, %v3088_v29  ;;  %v1530_v9 = vmul.f32 %v1461_v17, %v3093_v31 }
 0x484   : > { %v1516_v62 = vpop.permute.xlu0 %1515  ;;  %v1563_v16 = vpop.permute.xlu1 %1562 }
 0x485   : > { %v3457_v56 = vmul.f32 %v1516_v62, %v3202_v10  ;;  %v3460_v52 = vmul.f32 %v1516_v62, %v3204_v11  ;;  %v3462_v40 = vadd.f32 %v1563_v16, %v1525_v30  ;;  %v3464_v13 = vadd.f32 %v1563_v16, %v1526_v38 }
 0x487   : > { %v1669_v21 = vsub.f32 0.0, %v3462_v40  ;;  %v1670_v23 = vsub.f32 0.0, %v3464_v13 }
 0x488   : > { %v1558_v1 = vpop.permute.xlu0 %1557  ;;  %v1456_v60 = vpop.permute.xlu1 %1455 }
 0x489   : > { %v1703_v12 = vmul.f32 1.442695, %v1669_v21  ;;  %v1705_v10 = vmul.f32 1.442695, %v1670_v23  ;;  %v3470_v41 = vadd.f32 %v1558_v1, %v1523_v15  ;;  %v3472_v11 = vadd.f32 %v1558_v1, %v1524_v0 }
 0x48a   : > { %v1527_v14 = vmul.f32 %v1456_v60, %v3082_v26  ;;  %v1528_v44 = vmul.f32 %v1456_v60, %v3084_v27 }
 0x48b   : > { %2712 = vpow2.f32 %v1703_v12  ;;  %v1667_v49 = vsub.f32 0.0, %v3470_v41  ;;  %v1668_v22 = vsub.f32 0.0, %v3472_v11 }
 0x48c   : > { %2714 = vpow2.f32 %v1705_v10  ;;  %v1471_v18 = vpop.permute.xlu1 %1470  ;;  %v1466_v19 = vpop.permute.xlu0 %1465 }
 0x48d   : > { %v1699_v57 = vmul.f32 1.442695, %v1667_v49  ;;  %v1701_v4 = vmul.f32 1.442695, %v1668_v22  ;;  %v1533_v27 = vmul.f32 %v1471_v18, %v3108_v37  ;;  %v1534_v38 = vmul.f32 %v1471_v18, %v3113_v39 }
 0x48e   : > { %v1531_v0 = vmul.f32 %v1466_v19, %v3102_v34  ;;  %v1532_v23 = vmul.f32 %v1466_v19, %v3104_v35 }
 0x48f   : > { %2716 = vpow2.f32 %v1699_v57 }
 0x490   : > { %2718 = vpow2.f32 %v1701_v4  ;;  %v1573_v32 = vpop.permute.xlu1 %1572  ;;  %v1568_v24 = vpop.permute.xlu0 %1567 }
 0x491   : > { %v3480_v6 = vadd.f32 %v1573_v32, %v1529_v20  ;;  %v3482_v25 = vadd.f32 %v1573_v32, %v1530_v9  ;;  %v3484_v28 = vadd.f32 %v1568_v24, %v1527_v14  ;;  %v3486_v33 = vadd.f32 %v1568_v24, %v1528_v44 }
 0x493   : > { %v1673_v29 = vsub.f32 0.0, %v3480_v6  ;;  %v1674_v31 = vsub.f32 0.0, %v3482_v25  ;;  %v1671_v8 = vsub.f32 0.0, %v3484_v28  ;;  %v1672_v16 = vsub.f32 0.0, %v3486_v33 }
 0x494   : > { %v1481_v26 = vpop.permute.xlu1 %1480  ;;  %v1476_v36 = vpop.permute.xlu0 %1475 }
 0x495   : > { %v2713_v46 = vpop.eup %2712  ;;  %v1711_v3 = vmul.f32 1.442695, %v1673_v29  ;;  %v1713_v62 = vmul.f32 1.442695, %v1674_v31  ;;  %v1707_v21 = vmul.f32 1.442695, %v1671_v8  ;;  %v1537_v31 = vmul.f32 %v1481_v26, %v3128_v45 }
 0x496   : > { %v2715_v17 = vpop.eup %2714  ;;  %v1765_v30 = vadd.f32 1.0, %v2713_v46  ;;  %v1709_v18 = vmul.f32 1.442695, %v1672_v16  ;;  %v1538_v8 = vmul.f32 %v1481_v26, %v3133_v47  ;;  %v1535_v46 = vmul.f32 %v1476_v36, %v3122_v42 }
 0x497   : > { %v1766_v15 = vadd.f32 1.0, %v2715_v17  ;;  %2720 = vpow2.f32 %v1711_v3 }
 0x498   : > { %2722 = vrcp.f32 %v1765_v30  ;;  %v1583_v1 = vpop.permute.xlu1 %1582  ;;  %v1578_v60 = vpop.permute.xlu0 %1577 }
 0x499   : > { %v2717_v12 = vpop.eup %2716  ;;  %2724 = vrcp.f32 %v1766_v15  ;;  %v3496_v37 = vadd.f32 %v1583_v1, %v1533_v27  ;;  %v3498_v10 = vadd.f32 %v1583_v1, %v1534_v38  ;;  %v3500_v39 = vadd.f32 %v1578_v60, %v1531_v0 }
 0x49a   : > { %v2719_v49 = vpop.eup %2718  ;;  %v1763_v22 = vadd.f32 1.0, %v2717_v12  ;;  %2726 = vpow2.f32 %v1713_v62  ;;  %v3502_v34 = vadd.f32 %v1578_v60, %v1532_v23  ;;  %v1536_v27 = vmul.f32 %v1476_v36, %v3124_v43 }
 0x49b   : > { %v1764_v57 = vadd.f32 1.0, %v2719_v49  ;;  %2728 = vpow2.f32 %v1707_v21  ;;  %v1677_v35 = vsub.f32 0.0, %v3496_v37  ;;  %v1678_v19 = vsub.f32 0.0, %v3498_v10 }
 0x49c   : > { %2730 = vrcp.f32 %v1763_v22  ;;  %v1675_v4 = vsub.f32 0.0, %v3500_v39  ;;  %v1676_v20 = vsub.f32 0.0, %v3502_v34  ;;  %v1491_v9 = vpop.permute.xlu1 %1490  ;;  %v1486_v14 = vpop.permute.xlu0 %1485 }
 0x49d   : > { %2732 = vrcp.f32 %v1764_v57  ;;  %v1719_v44 = vmul.f32 1.442695, %v1677_v35  ;;  %v1721_v32 = vmul.f32 1.442695, %v1678_v19  ;;  %v1541_v22 = vmul.f32 %v1491_v9, %v3148_v53 }
 0x49e   : > { %2734 = vpow2.f32 %v1709_v18  ;;  %v1715_v24 = vmul.f32 1.442695, %v1675_v4  ;;  %v1717_v29 = vmul.f32 1.442695, %v1676_v20  ;;  %v1539_v4 = vmul.f32 %v1486_v14, %v3142_v50 }
 0x49f   : > { %2736 = vpow2.f32 %v1719_v44 }
 0x4a0   : > { %2738 = vpow2.f32 %v1721_v32  ;;  %v1593_v3 = vpop.permute.xlu1 %1592  ;;  %v1588_v17 = vpop.permute.xlu0 %1587  ;;  %v1540_v32 = vmul.f32 %v1486_v14, %v3144_v51 }
 0x4a1   : > { %v2721_v30 = vpop.eup %2720  ;;  %2740 = vpow2.f32 %v1715_v24  ;;  %v3513_v38 = vadd.f32 %v1593_v3, %v1537_v31  ;;  %v3515_v62 = vadd.f32 %v1593_v3, %v1538_v8  ;;  %v3517_v16 = vadd.f32 %v1588_v17, %v1535_v46 }
 0x4a2   : > { %v2723_v15 = vpop.eup %2722  ;;  %v1769_v45 = vadd.f32 1.0, %v2721_v30  ;;  %2742 = vpow2.f32 %v1717_v29  ;;  %v3524_v36 = vadd.f32 %v1588_v17, %v1536_v27 }
 0x4a3   : > { %v2725_v42 = vpop.eup %2724  ;;  %v1829_v47 = vmul.f32 %v2723_v15, %v3462_v40  ;;  %v1681_v43 = vsub.f32 0.0, %v3513_v38  ;;  %v1682_v26 = vsub.f32 0.0, %v3515_v62  ;;  %v1679_v23 = vsub.f32 0.0, %v3517_v16 }
 0x4a4   : > { %v2727_v0 = vpop.eup %2726  ;;  %v1830_v21 = vmul.f32 %v2725_v42, %v3464_v13  ;;  %2744 = vrcp.f32 %v1769_v45  ;;  %v1501_v1 = vpop.permute.xlu1 %1500  ;;  %v1542_v40 = vmul.f32 %v1491_v9, %v3153_v55  ;;  %v1680_v24 = vsub.f32 0.0, %v3524_v36 }
 0x4a5   : > { %v1496_v60 = vpop.permute.xlu0 %1495  ;;  %v2729_v12 = vpop.eup %2728  ;;  %v1770_v49 = vadd.f32 1.0, %v2727_v0  ;;  %v1727_v18 = vmul.f32 1.442695, %v1681_v43  ;;  %v1729_v20 = vmul.f32 1.442695, %v1682_v26  ;;  %v1545_v50 = vmul.f32 %v1501_v1, %v3168_v61 }
 0x4a6   : > { %v2731_v57 = vpop.eup %2730  ;;  %v2150_v35 = vpack.c.bf16 %v1830_v21, %v1829_v47  ;;  %v1767_v19 = vadd.f32 1.0, %v2729_v12  ;;  %v1723_v55 = vmul.f32 1.442695, %v1679_v23  ;;  %v1725_v23 = vmul.f32 1.442695, %v1680_v24 }
 0x4a7   : > { %v2733_v44 = vpop.eup %2732  ;;  %v1827_v13 = vmul.f32 %v2731_v57, %v3470_v41  ;;  %2746 = vrcp.f32 %v1770_v49  ;;  %v1546_v12 = vmul.f32 %v1501_v1, %v3173_v63  ;;  %v1544_v57 = vmul.f32 %v1496_v60, %v3164_v59 }
 0x4a8   : > { %v2735_v29 = vpop.eup %2734  ;;  %1956 = vst [vmem:[%s3534_s28 + $0x8] sm:$0xff] %v2150_v35  ;;  %v1828_v53 = vmul.f32 %v2733_v44, %v3472_v11  ;;  %2748 = vrcp.f32 %v1767_v19  ;;  %v1603_v9 = vpop.permute.xlu1 %1602 }
 0x4a9   : > { %v1598_v31 = vpop.permute.xlu0 %1597  ;;  %v2737_v8 = vpop.eup %2736  ;;  %v1768_v41 = vadd.f32 1.0, %v2735_v29  ;;  %2750 = vpow2.f32 %v1727_v18  ;;  %v3539_v51 = vadd.f32 %v1603_v9, %v1541_v22  ;;  %v3541_v14 = vadd.f32 %v1603_v9, %v1542_v40 }
 0x4aa   : > { %v2739_v46 = vpop.eup %2738  ;;  %v2149_v27 = vpack.c.bf16 %v1828_v53, %v1827_v13  ;;  %v1773_v3 = vadd.f32 1.0, %v2737_v8  ;;  %2752 = vpow2.f32 %v1729_v20  ;;  %v3543_v17 = vadd.f32 %v1598_v31, %v1539_v4 }
 0x4ab   : > { %v2741_v11 = vpop.eup %2740  ;;  %2754 = vrcp.f32 %v1768_v41  ;;  %v1774_v30 = vadd.f32 1.0, %v2739_v46  ;;  %v1685_v61 = vsub.f32 0.0, %v3539_v51  ;;  %v1686_v15 = vsub.f32 0.0, %v3541_v14 }
 0x4ac   : > { %v2743_v45 = vpop.eup %2742  ;;  %1955 = vst [vmem:[%s3534_s28] sm:$0xff] %v2149_v27  ;;  %2756 = vrcp.f32 %v1773_v3  ;;  %v1771_v42 = vadd.f32 1.0, %v2741_v11  ;;  %v3548_v47 = vadd.f32 %v1598_v31, %v1540_v32  ;;  %v1683_v43 = vsub.f32 0.0, %v3543_v17  ;;  %v1511_v26 = vpop.permute.xlu1 %1510 }
 0x4ad   : > { %v3551_v0 = vpop.permute.xlu0 %1505  ;;  %2758 = vrcp.f32 %v1774_v30  ;;  %v1772_v21 = vadd.f32 1.0, %v2743_v45  ;;  %v1543_v22 = vmul.f32 %v1496_v60, %v3162_v58  ;;  %v1735_v40 = vmul.f32 1.442695, %v1685_v61 }
 0x4ae   : > { %v2745_v49 = vpop.eup %2744  ;;  %2760 = vrcp.f32 %v1771_v42  ;;  %v1684_v18 = vsub.f32 0.0, %v3548_v47  ;;  %v1737_v35 = vmul.f32 1.442695, %v1686_v15  ;;  %v1731_v19 = vmul.f32 1.442695, %v1683_v43 }
 0x4af   : > { %2762 = vrcp.f32 %v1772_v21  ;;  %v1833_v4 = vmul.f32 %v2745_v49, %v3480_v6  ;;  %v1549_v44 = vmul.f32 %v1511_v26, %v3188_v5  ;;  %v1550_v6 = vmul.f32 %v1511_v26, %v3193_v7 }
 0x4b0   : > { %2764 = vpow2.f32 %v1723_v55  ;;  %v1733_v20 = vmul.f32 1.442695, %v1684_v18  ;;  %v1613_v13 = vpop.permute.xlu1 %1612 }
 0x4b1   : > { %v1608_v63 = vpop.permute.xlu0 %1607  ;;  %v2747_v1 = vpop.eup %2746  ;;  %2766 = vpow2.f32 %v1725_v23  ;;  %v3559_v32 = vadd.f32 %v1613_v13, %v1545_v50  ;;  %v3561_v58 = vadd.f32 %v1613_v13, %v1546_v12 }
 0x4b2   : > { %v3563_v24 = vadd.f32 %v1608_v63, %v1543_v22  ;;  %v2749_v29 = vpop.eup %2748  ;;  %v1834_v59 = vmul.f32 %v2747_v1, %v3482_v25  ;;  %2768 = vpow2.f32 %v1735_v40  ;;  %v3567_v60 = vadd.f32 %v1608_v63, %v1544_v57 }
 0x4b3   : > { %v2751_v53 = vpop.eup %2750  ;;  %v1831_v5 = vmul.f32 %v2749_v29, %v3484_v28  ;;  %2770 = vpow2.f32 %v1737_v35  ;;  %v1689_v55 = vsub.f32 0.0, %v3559_v32  ;;  %v1690_v50 = vsub.f32 0.0, %v3561_v58 }
 0x4b4   : > { %v2753_v9 = vpop.eup %2752  ;;  %v2152_v31 = vpack.c.bf16 %v1834_v59, %v1833_v4  ;;  %v1777_v8 = vadd.f32 1.0, %v2751_v53  ;;  %2772 = vpow2.f32 %v1731_v19  ;;  %v1687_v25 = vsub.f32 0.0, %v3563_v24  ;;  %v1623_v41 = vpop.permute.xlu1 %1622 }
 0x4b5   : > { %v2755_v46 = vpop.eup %2754  ;;  %v1778_v7 = vadd.f32 1.0, %v2753_v9  ;;  %2774 = vpow2.f32 %v1733_v20  ;;  %v1743_v27 = vmul.f32 1.442695, %v1689_v55  ;;  %v1745_v3 = vmul.f32 1.442695, %v1690_v50 }
 0x4b6   : > { %v2757_v11 = vpop.eup %2756  ;;  %1958 = vst [vmem:[%s3534_s28 + $0x18] sm:$0xff] %v2152_v31  ;;  %v1832_v28 = vmul.f32 %v2755_v46, %v3486_v33  ;;  %2776 = vrcp.f32 %v1777_v8  ;;  %v1688_v30 = vsub.f32 0.0, %v3567_v60  ;;  %v1739_v61 = vmul.f32 1.442695, %v1687_v25  ;;  %v1618_v33 = vpop.permute.xlu0 %1617 }
 0x4b7   : > { %v2759_v15 = vpop.eup %2758  ;;  %v1837_v45 = vmul.f32 %v2757_v11, %v3496_v37  ;;  %2778 = vrcp.f32 %v1778_v7  ;;  %v3577_v42 = vadd.f32 %v1623_v41, %v1549_v44  ;;  %v3579_v43 = vadd.f32 %v1623_v41, %v1550_v6  ;;  %v3713_v44 = vld [vmem:[#allocation5_spill] sm:$0xff] }
 0x4b8   : > { %v2761_v26 = vpop.eup %2760  ;;  %v2151_v21 = vpack.c.bf16 %v1832_v28, %v1831_v5  ;;  %v1838_v23 = vmul.f32 %v2759_v15, %v3498_v10  ;;  %2780 = vpow2.f32 %v1743_v27  ;;  %v1741_v12 = vmul.f32 1.442695, %v1688_v30 }
 0x4b9   : > { %v2763_v49 = vpop.eup %2762  ;;  %v1835_v22 = vmul.f32 %v2761_v26, %v3500_v39  ;;  %2782 = vpow2.f32 %v1745_v3  ;;  %v1547_v10 = vmul.f32 %v3551_v0, %v3182_v2  ;;  %v1693_v19 = vsub.f32 0.0, %v3577_v42 }
 0x4ba   : > { %v2765_v40 = vpop.eup %2764  ;;  %1957 = vst [vmem:[%s3534_s28 + $0x10] sm:$0xff] %v2151_v21  ;;  %v2154_v37 = vpack.c.bf16 %v1838_v23, %v1837_v45  ;;  %v1836_v18 = vmul.f32 %v2763_v49, %v3502_v34  ;;  %2784 = vpow2.f32 %v1739_v61  ;;  %v1548_v13 = vmul.f32 %v3551_v0, %v3713_v44  ;;  %v1633_v34 = vpop.permute.xlu1 %1632 }
 0x4bb   : > { %v2767_v57 = vpop.eup %2766  ;;  %v1775_v35 = vadd.f32 1.0, %v2765_v40  ;;  %2786 = vpow2.f32 %v1741_v12  ;;  %v1694_v63 = vsub.f32 0.0, %v3579_v43  ;;  %v3592_v59 = vadd.f32 %v1618_v33, %v1547_v10  ;;  %v1628_v5 = vpop.permute.xlu0 %1627 }
 0x4bc   : > { %v2769_v4 = vpop.eup %2768  ;;  %1960 = vst [vmem:[%s3534_s28 + $0x28] sm:$0xff] %v2154_v37  ;;  %v2153_v20 = vpack.c.bf16 %v1836_v18, %v1835_v22  ;;  %v1776_v39 = vadd.f32 1.0, %v2767_v57  ;;  %v3595_v53 = vadd.f32 %v1618_v33, %v1548_v13  ;;  %v1751_v9 = vmul.f32 1.442695, %v1693_v19 }
 0x4bd   : > { %v2771_v1 = vpop.eup %2770  ;;  %2788 = vrcp.f32 %v1775_v35  ;;  %v1781_v29 = vadd.f32 1.0, %v2769_v4  ;;  %v3598_v0 = vadd.f32 %v1633_v34, %v3449_v48  ;;  %v1753_v25 = vmul.f32 1.442695, %v1694_v63 }
 0x4be   : > { %v2773_v6 = vpop.eup %2772  ;;  %1959 = vst [vmem:[%s3534_s28 + $0x20] sm:$0xff] %v2153_v20  ;;  %2790 = vrcp.f32 %v1776_v39  ;;  %v1782_v2 = vadd.f32 1.0, %v2771_v1  ;;  %v3601_v41 = vadd.f32 %v1633_v34, %v3452_v54  ;;  %v1691_v27 = vsub.f32 0.0, %v3592_v59 }
 0x4bf   : > { %v2775_v55 = vpop.eup %2774  ;;  %2792 = vrcp.f32 %v1781_v29  ;;  %v1779_v50 = vadd.f32 1.0, %v2773_v6  ;;  %v3606_v3 = vadd.f32 %v1628_v5, %v3457_v56  ;;  %v1692_v28 = vsub.f32 0.0, %v3595_v53 }
 0x4c0   : > { %v2777_v31 = vpop.eup %2776  ;;  %2794 = vrcp.f32 %v1782_v2  ;;  %v1780_v8 = vadd.f32 1.0, %v2775_v55  ;;  %v3611_v30 = vadd.f32 %v1628_v5, %v3460_v52  ;;  %v1698_v56 = vsub.f32 0.0, %v3601_v41 }
 0x4c1   : > { %v2779_v46 = vpop.eup %2778  ;;  %v1841_v7 = vmul.f32 %v2777_v31, %v3513_v38  ;;  %2796 = vrcp.f32 %v1779_v50  ;;  %v1697_v38 = vsub.f32 0.0, %v3598_v0  ;;  %v1747_v23 = vmul.f32 1.442695, %v1691_v27 }
 0x4c2   : > { %v2781_v11 = vpop.eup %2780  ;;  %v1842_v48 = vmul.f32 %v2779_v46, %v3515_v62  ;;  %2798 = vrcp.f32 %v1780_v8  ;;  %v1695_v12 = vsub.f32 0.0, %v3606_v3  ;;  %v1749_v33 = vmul.f32 1.442695, %v1692_v28 }
 0x4c3   : > { %v2783_v54 = vpop.eup %2782  ;;  %v1785_v61 = vadd.f32 1.0, %v2781_v11  ;;  %2800 = vpow2.f32 %v1751_v9  ;;  %v1696_v49 = vsub.f32 0.0, %v3611_v30  ;;  %v1759_v40 = vmul.f32 1.442695, %v1697_v38 }
 0x4c4   : > { %v2785_v15 = vpop.eup %2784  ;;  %v2156_v45 = vpack.c.bf16 %v1842_v48, %v1841_v7  ;;  %v1786_v26 = vadd.f32 1.0, %v2783_v54  ;;  %2802 = vpow2.f32 %v1753_v25  ;;  %v1761_v57 = vmul.f32 1.442695, %v1698_v56 }
 0x4c5   : > { %v2787_v21 = vpop.eup %2786  ;;  %2804 = vrcp.f32 %v1785_v61  ;;  %v1783_v62 = vadd.f32 1.0, %v2785_v15  ;;  %v1755_v19 = vmul.f32 1.442695, %v1695_v12  ;;  %v1757_v39 = vmul.f32 1.442695, %v1696_v49 }
 0x4c6   : > { %1962 = vst [vmem:[%s3534_s28 + $0x38] sm:$0xff] %v2156_v45  ;;  %2806 = vrcp.f32 %v1786_v26  ;;  %v1784_v52 = vadd.f32 1.0, %v2787_v21 }
 0x4c7   : > { %v2789_v22 = vpop.eup %2788  ;;  %2808 = vrcp.f32 %v1783_v62 }
 0x4c8   : > { %v2791_v37 = vpop.eup %2790  ;;  %v1839_v18 = vmul.f32 %v2789_v22, %v3517_v16  ;;  %2810 = vrcp.f32 %v1784_v52 }
 0x4c9   : > { %v2793_v35 = vpop.eup %2792  ;;  %v1840_v10 = vmul.f32 %v2791_v37, %v3524_v36  ;;  %2812 = vpow2.f32 %v1747_v23 }
 0x4ca   : > { %v2795_v4 = vpop.eup %2794  ;;  %v1845_v20 = vmul.f32 %v2793_v35, %v3539_v51  ;;  %2814 = vpow2.f32 %v1749_v33 }
 0x4cb   : > { %v2797_v44 = vpop.eup %2796  ;;  %v2155_v13 = vpack.c.bf16 %v1840_v10, %v1839_v18  ;;  %v1846_v63 = vmul.f32 %v2795_v4, %v3541_v14  ;;  %2816 = vpow2.f32 %v1759_v40 }
 0x4cc   : > { %v2799_v16 = vpop.eup %2798  ;;  %v1843_v34 = vmul.f32 %v2797_v44, %v3543_v17  ;;  %2818 = vpow2.f32 %v1761_v57 }
 0x4cd   : > { %v2801_v1 = vpop.eup %2800  ;;  %1961 = vst [vmem:[%s3534_s28 + $0x30] sm:$0xff] %v2155_v13  ;;  %v2158_v36 = vpack.c.bf16 %v1846_v63, %v1845_v20  ;;  %v1844_v29 = vmul.f32 %v2799_v16, %v3548_v47  ;;  %2820 = vpow2.f32 %v1755_v19 }
 0x4ce   : > { %v2803_v51 = vpop.eup %2802  ;;  %v1789_v6 = vadd.f32 1.0, %v2801_v1  ;;  %2822 = vpow2.f32 %v1757_v39 }
 0x4cf   : > { %v2805_v2 = vpop.eup %2804  ;;  %1964 = vst [vmem:[%s3534_s28 + $0x48] sm:$0xff] %v2158_v36  ;;  %v2157_v5 = vpack.c.bf16 %v1844_v29, %v1843_v34  ;;  %v1790_v55 = vadd.f32 1.0, %v2803_v51 }
 0x4d0   : > { %v2807_v14 = vpop.eup %2806  ;;  %v1849_v50 = vmul.f32 %v2805_v2, %v3559_v32  ;;  %2824 = vrcp.f32 %v1789_v6 }
 0x4d1   : > { %v2809_v17 = vpop.eup %2808  ;;  %1963 = vst [vmem:[%s3534_s28 + $0x40] sm:$0xff] %v2157_v5  ;;  %v1850_v9 = vmul.f32 %v2807_v14, %v3561_v58  ;;  %2826 = vrcp.f32 %v1790_v55 }
 0x4d2   : > { %v2811_v47 = vpop.eup %2810  ;;  %v1847_v31 = vmul.f32 %v2809_v17, %v3563_v24 }
 0x4d3   : > { %v2813_v8 = vpop.eup %2812  ;;  %v2160_v25 = vpack.c.bf16 %v1850_v9, %v1849_v50  ;;  %v1848_v46 = vmul.f32 %v2811_v47, %v3567_v60 }
 0x4d4   : > { %v2815_v7 = vpop.eup %2814  ;;  %v1787_v27 = vadd.f32 1.0, %v2813_v8 }
 0x4d5   : > { %v2817_v11 = vpop.eup %2816  ;;  %1966 = vst [vmem:[%s3534_s28 + $0x58] sm:$0xff] %v2160_v25  ;;  %v2159_v48 = vpack.c.bf16 %v1848_v46, %v1847_v31  ;;  %v1788_v32 = vadd.f32 1.0, %v2815_v7 }
 0x4d6   : > { %v2819_v28 = vpop.eup %2818  ;;  %2828 = vrcp.f32 %v1787_v27  ;;  %v1793_v54 = vadd.f32 1.0, %v2817_v11 }
 0x4d7   : > { %v2821_v61 = vpop.eup %2820  ;;  %1965 = vst [vmem:[%s3534_s28 + $0x50] sm:$0xff] %v2159_v48  ;;  %2830 = vrcp.f32 %v1788_v32  ;;  %v1794_v58 = vadd.f32 1.0, %v2819_v28 }
 0x4d8   : > { %v2823_v38 = vpop.eup %2822  ;;  %2832 = vrcp.f32 %v1793_v54  ;;  %v1791_v24 = vadd.f32 1.0, %v2821_v61 }
 0x4d9   : > { %2834 = vrcp.f32 %v1794_v58  ;;  %v1792_v15 = vadd.f32 1.0, %v2823_v38 }
 0x4da   : > { %v2825_v60 = vpop.eup %2824  ;;  %2836 = vrcp.f32 %v1791_v24 }
 0x4db   : > { %v2827_v45 = vpop.eup %2826  ;;  %v1853_v26 = vmul.f32 %v2825_v60, %v3577_v42  ;;  %2838 = vrcp.f32 %v1792_v15 }
 0x4dc   : > { %v1854_v56 = vmul.f32 %v2827_v45, %v3579_v43 }
 0x4de   : > { %v2162_v21 = vpack.c.bf16 %v1854_v56, %v1853_v26 }
 0x4e0   : > { %v2829_v62 = vpop.eup %2828  ;;  %1968 = vst [vmem:[%s3534_s28 + $0x68] sm:$0xff] %v2162_v21 }
 0x4e1   : > { %v2831_v23 = vpop.eup %2830  ;;  %v1851_v12 = vmul.f32 %v2829_v62, %v3592_v59 }
 0x4e2   : > { %v2833_v52 = vpop.eup %2832  ;;  %v1852_v33 = vmul.f32 %v2831_v23, %v3595_v53 }
 0x4e3   : > { %v2835_v49 = vpop.eup %2834  ;;  %v1857_v22 = vmul.f32 %v2833_v52, %v3598_v0 }
 0x4e4   : > { %v2837_v42 = vpop.eup %2836  ;;  %v2161_v40 = vpack.c.bf16 %v1852_v33, %v1851_v12  ;;  %v1858_v43 = vmul.f32 %v2835_v49, %v3601_v41 }
 0x4e5   : > { %v2839_v37 = vpop.eup %2838  ;;  %v1855_v18 = vmul.f32 %v2837_v42, %v3606_v3 }
 0x4e6   : > { %1967 = vst [vmem:[%s3534_s28 + $0x60] sm:$0xff] %v2161_v40  ;;  %v2164_v59 = vpack.c.bf16 %v1858_v43, %v1857_v22  ;;  %v1856_v57 = vmul.f32 %v2839_v37, %v3611_v30 }
 0x4e8   : > { %1970 = vst [vmem:[%s3534_s28 + $0x78] sm:$0xff] %v2164_v59  ;;  %v2163_v53 = vpack.c.bf16 %v1856_v57, %v1855_v18 }
 0x4ea   : > { %1969 = vst [vmem:[%s3534_s28 + $0x70] sm:$0xff] %v2163_v53 }
 0x4eb   : > { %2853 = shalt.err (!%p2850_p5)
}
 0x4ec   : > { %s2854_s18 = scalar_lea.hbm %s3648_s13, 2048  ;;  %s2858_s27 = scalar_lea.hbm %s3708_s6, 4096 }
 0x4ed   : > { %p2855_p6 = scmp.ne.s32.totalorder %s3648_s13, %s2854_s18  ;;  %p2859_p10 = scmp.lt.u32.totalorder %s3648_s13, %s3708_s6 }
 0x4ee   : > { %p2860_p11 = scmp.lt.u32.totalorder %s2858_s27, %s2854_s18  ;;  %p2862_p13 = scmp.lt.u32.totalorder %s2854_s18, %s3648_s13 }
 0x4ef   : > { %p2856_p7 = pnand %p2855_p6, %p3000_p4 }
 0x4f0   : > { %p2861_p12 = por %p2860_p11, %p2859_p10 }
 0x4f1   : > { %p2857_p9 = pneg %p2856_p7 }
 0x4f2   : > { %p2863_p0 = por %p2862_p13, %p2861_p12 }
 0x4f4   : > { %p2864_p1 = pnand %p2863_p0, %p2857_p9 }
 0x4f6   : > { %2867 = shalt.err (!%p2864_p1)
}
 0x4f7   : > { %s2923_s11 = smov 128   ;;  %s2924_s12 = smov 8  }
 0x4f8   : > { %2631 = dma.vmem_to_hbm [thread:$0]  (%p3000_p4), %s3650_s8, 2048, %s3648_s13, %s3656_s24, %s2923_s11, %s2923_s11, %s2924_s12  }
 0x4f9 PF: > { %p2637_p2 = scmp.ge.s32.totalorder %s2918_s26, 2  ;;  %s2002_s14 = sand.u32 1, %s2898_s21  }
 0x4fa   : > { %s2003_s15 = scalar_lea.sflag [#allocation3], %s2002_s14 }
 0x4fb   : > { %p2634_p3 = pnand %p2637_p2, %p3007_p8 }
 0x4fd   : > { %2893 = dma.done.wait (!%p2634_p3), %s2003_s15, 2048  }
 0x4fe   : > { %2895 = vsyncadd (!%p2634_p3), %s2003_s15, 4294965248  ;;  %s19_s26 = sadd.s32 1, %s2918_s26   ;;  %s3714_s21 = smov %s2902_s22 }
 0x4ff   : > { %p16_p5 = scmp.ge.s32.totalorder %s19_s26, 4   ;;  %s3715_s22 = smov %s2906_s23 }
 0x500   : > { %s3716_s23 = smov %s3013_s10  ;;  %s3717_s24 = smov %s2914_s25 }
 0x501   : > { %s3718_s25 = smov %s3720_s29  ;;  %18 = sbr.rel (!%p16_p5) target bundleno = 4 (0x4), region = 79 }
 0x508   :  { %2008 = vsyncpa [#allocation3], 1 }
 0x509   :  { %2010 = vsyncpa [#allocation3 + $0x1], 1 }

</bundles_post_ra>
